<compile_context>
chip_gen: v6e
topology: v6e:2x2x1
jax: 0.10.0
libtpu: 0.0.40
codegen_flags: <defaults>
</compile_context>

<pallas_src>
import functools
import math

import jax
import jax.numpy as jnp
import numpy as np
from jax.experimental import pallas as pl
from jax.experimental.pallas import tpu as pltpu


def _round_up(x, m):
    return pl.cdiv(x, m) * m


# ---------------------------------------------------------------------------
# Kernel bodies
# ---------------------------------------------------------------------------
def _mha_block_kernel(xq_ref, xkv_ref, wq_ref, bq_ref, wkv_ref, bkv_ref,
                      wo_ref, bo_ref, bias_ref, g_ref, beta_ref, o_ref,
                      *, nhead, scale, eps, compute_dtype):
    """Per batch element: q/kv proj -> per-head attention -> out proj ->
    residual add -> LayerNorm.  All heads in one grid step so the output is a
    lane-dense (S_q, D) block."""
    cd = compute_dtype
    xq = xq_ref[...]                                          # (Sq, D) f32
    xkv = xkv_ref[...]                                        # (Skv, D) f32

    q = jnp.dot(xq.astype(cd), wq_ref[...].astype(cd),
                preferred_element_type=jnp.float32) + bq_ref[...]
    kv = jnp.dot(xkv.astype(cd), wkv_ref[...].astype(cd),
                 preferred_element_type=jnp.float32) + bkv_ref[...]

    d_model = q.shape[-1]
    dh = d_model // nhead
    k = kv[:, :d_model]
    v = kv[:, d_model:]

    head_outs = []
    for h in range(nhead):                                    # static unroll
        qh = q[:, h * dh:(h + 1) * dh]
        kh = k[:, h * dh:(h + 1) * dh]
        vh = v[:, h * dh:(h + 1) * dh]
        s = jax.lax.dot_general(qh.astype(cd), kh.astype(cd),
                                (((1,), (1,)), ((), ())),
                                preferred_element_type=jnp.float32)
        s = s * scale + bias_ref[h]                           # (Sq, Skv)
        m = jnp.max(s, axis=-1, keepdims=True)
        p = jnp.exp(s - m)
        p = p * pl.reciprocal(jnp.sum(p, axis=-1, keepdims=True), approx=True)
        head_outs.append(jnp.dot(p.astype(cd), vh.astype(cd),
                                 preferred_element_type=jnp.float32))
    attn = jnp.concatenate(head_outs, axis=-1)                # (Sq, D)

    proj = jnp.dot(attn.astype(cd), wo_ref[...].astype(cd),
                   preferred_element_type=jnp.float32) + bo_ref[...]

    y = xq + proj                                             # residual
    mean = jnp.mean(y, axis=-1, keepdims=True)
    yc = y - mean
    var = jnp.mean(yc * yc, axis=-1, keepdims=True)
    inv = jax.lax.rsqrt(var + eps)
    o_ref[...] = (yc * inv * g_ref[...] + beta_ref[...]).astype(o_ref.dtype)


def _ffn_block_kernel(x_ref, w1_ref, b1_ref, w2_ref, b2_ref, g_ref, beta_ref,
                      o_ref, *, eps, compute_dtype):
    """Row tile: relu(x@W1+b1)@W2+b2 -> residual add -> LayerNorm.  The
    (tm, dim_ff) hidden activation lives only in VMEM/vregs (no HBM trip)."""
    cd = compute_dtype
    x = x_ref[...]                                            # (tm, D) f32
    h = jnp.dot(x.astype(cd), w1_ref[...].astype(cd),
                preferred_element_type=jnp.float32) + b1_ref[...]
    h = jnp.maximum(h, 0.0)
    ff = jnp.dot(h.astype(cd), w2_ref[...].astype(cd),
                 preferred_element_type=jnp.float32) + b2_ref[...]
    y = x + ff
    mean = jnp.mean(y, axis=-1, keepdims=True)
    yc = y - mean
    var = jnp.mean(yc * yc, axis=-1, keepdims=True)
    inv = jax.lax.rsqrt(var + eps)
    o_ref[...] = (yc * inv * g_ref[...] + beta_ref[...]).astype(o_ref.dtype)


# ---------------------------------------------------------------------------
# Pallas wrappers
# ---------------------------------------------------------------------------
def mha_block(xq, xkv, wq, bq, wkv, bkv, wo, bo, mask_bias, gamma, beta,
              *, nhead, eps, compute_dtype):
    """xq: (B, Sq, D) query source; xkv: (B, Skv, D) key/value source;
    mask_bias: (H, Sq, Skv) additive.  Returns LayerNorm(xq + MHA(...))."""
    B, Sq, D = xq.shape
    Skv = xkv.shape[1]
    H = nhead
    scale = 1.0 / math.sqrt(D // H)
    kernel = functools.partial(_mha_block_kernel, nhead=H, scale=scale,
                               eps=eps, compute_dtype=compute_dtype)
    return pl.pallas_call(
        kernel,
        out_shape=jax.ShapeDtypeStruct((B, Sq, D), xq.dtype),
        grid_spec=pltpu.PrefetchScalarGridSpec(
            num_scalar_prefetch=0,
            grid=(B,),
            in_specs=[
                pl.BlockSpec((None, Sq, D), lambda b: (b, 0, 0)),
                pl.BlockSpec((None, Skv, D), lambda b: (b, 0, 0)),
                pl.BlockSpec((D, D), lambda b: (0, 0)),        # wq  (resident)
                pl.BlockSpec((1, D), lambda b: (0, 0)),        # bq
                pl.BlockSpec((D, 2 * D), lambda b: (0, 0)),    # wkv (resident)
                pl.BlockSpec((1, 2 * D), lambda b: (0, 0)),    # bkv
                pl.BlockSpec((D, D), lambda b: (0, 0)),        # wo  (resident)
                pl.BlockSpec((1, D), lambda b: (0, 0)),        # bo
                pl.BlockSpec((H, Sq, Skv), lambda b: (0, 0, 0)),  # bias
                pl.BlockSpec((1, D), lambda b: (0, 0)),        # gamma
                pl.BlockSpec((1, D), lambda b: (0, 0)),        # beta
            ],
            out_specs=pl.BlockSpec((None, Sq, D), lambda b: (b, 0, 0)),
        ),
        compiler_params=pltpu.CompilerParams(
            dimension_semantics=("parallel",)),
    )(xq, xkv, wq, bq.reshape(1, D), wkv, bkv.reshape(1, 2 * D),
      wo, bo.reshape(1, D), mask_bias, gamma.reshape(1, D), beta.reshape(1, D))


def ffn_block(x, w1, b1, w2, b2, gamma, beta, *, eps, compute_dtype,
              block_rows=512):
    """LayerNorm(x + relu(x@W1+b1)@W2+b2), x: (N, D), row-tiled."""
    n, d = x.shape
    f = w1.shape[1]
    tm = min(block_rows, _round_up(n, 8))
    n_pad = _round_up(n, tm)
    xp = jnp.pad(x, ((0, n_pad - n), (0, 0))) if n_pad != n else x
    kernel = functools.partial(_ffn_block_kernel, eps=eps,
                               compute_dtype=compute_dtype)
    out = pl.pallas_call(
        kernel,
        out_shape=jax.ShapeDtypeStruct((n_pad, d), x.dtype),
        grid_spec=pltpu.PrefetchScalarGridSpec(
            num_scalar_prefetch=0,
            grid=(n_pad // tm,),
            in_specs=[
                pl.BlockSpec((tm, d), lambda i: (i, 0)),
                pl.BlockSpec((d, f), lambda i: (0, 0)),        # w1 (resident)
                pl.BlockSpec((1, f), lambda i: (0, 0)),
                pl.BlockSpec((f, d), lambda i: (0, 0)),        # w2 (resident)
                pl.BlockSpec((1, d), lambda i: (0, 0)),
                pl.BlockSpec((1, d), lambda i: (0, 0)),        # gamma
                pl.BlockSpec((1, d), lambda i: (0, 0)),        # beta
            ],
            out_specs=pl.BlockSpec((tm, d), lambda i: (i, 0)),
        ),
        compiler_params=pltpu.CompilerParams(
            dimension_semantics=("parallel",)),
    )(xp, w1, b1.reshape(1, f), w2, b2.reshape(1, d),
      gamma.reshape(1, d), beta.reshape(1, d))
    return out[:n] if n_pad != n else out


# ---------------------------------------------------------------------------
# Static bucket computation (faithful to _relative_position_bucket, bidir=False)
# ---------------------------------------------------------------------------
def _relative_position_buckets(q_len, k_len, num_buckets):
    ctx = np.arange(q_len)[:, None]
    mem = np.arange(k_len)[None, :]
    rel = mem - ctx
    rp = -np.minimum(rel, 0)                       # max(i - j, 0)
    rp = rp.copy()
    if q_len != k_len:
        d = k_len - q_len
        first = rp[:, :q_len].copy()               # RHS evaluated before write
        rp[:, d:] = first
        rp[:, :d] = np.arange(d)[None, :] + num_buckets
    return rp.astype(np.int32)


# ---------------------------------------------------------------------------
# Full decoder-layer forward (post-norm, eval mode)
# ---------------------------------------------------------------------------
def t5_decoder_layer(tgt, memory, tgt_mask, memory_mask, params, *,
                     nhead, num_buckets, eps=1e-5, compute_dtype=jnp.float32):
    S_t, B, D = tgt.shape
    S_m = memory.shape[0]
    H = nhead
    p = params

    # Relative-position bias: bucket indices are static numpy -> trivial gather
    # from the tiny embedding table, folded into the additive attention mask.
    buckets_sa = _relative_position_buckets(S_t, S_t, num_buckets)
    buckets_mha = _relative_position_buckets(S_t, S_m, num_buckets)
    bias_sa = jnp.transpose(p["table_sa"][buckets_sa], (2, 0, 1))     # (H,St,St)
    bias_mha = jnp.transpose(p["table_mha"][buckets_mha], (2, 0, 1))  # (H,St,Sm)
    mask_bias_sa = tgt_mask[None] + bias_sa
    mask_bias_mha = memory_mask[None] + bias_mha

    # Single (seq,batch,D) -> (batch,seq,D) transpose per tensor; the fused
    # kernels never need per-head split/merge transposes.
    xb = jnp.transpose(tgt, (1, 0, 2))
    memb = jnp.transpose(memory, (1, 0, 2))

    # Self-attention projection is stored packed as (D, 3D); split q / kv cols.
    wq_sa, wkv_sa = p["sa_wqkv"][:, :D], p["sa_wqkv"][:, D:]
    bq_sa, bkv_sa = p["sa_bqkv"][:D], p["sa_bqkv"][D:]

    kw = dict(nhead=H, eps=eps, compute_dtype=compute_dtype)

    # ---- self-attention block (proj + attn + out-proj + residual + LN) ----
    x = mha_block(xb, xb, wq_sa, bq_sa, wkv_sa, bkv_sa,
                  p["sa_wo"], p["sa_bo"], mask_bias_sa,
                  p["ln1_g"], p["ln1_b"], **kw)

    # ---- cross-attention block ----
    x = mha_block(x, memb, p["ca_wq"], p["ca_bq"], p["ca_wkv"], p["ca_bkv"],
                  p["ca_wo"], p["ca_bo"], mask_bias_mha,
                  p["ln2_g"], p["ln2_b"], **kw)

    # ---- feed-forward block (W1 + relu + W2 + residual + LN fused) ----
    x2 = ffn_block(x.reshape(B * S_t, D), p["w1"], p["b1"], p["w2"], p["b2"],
                   p["ln3_g"], p["ln3_b"], eps=eps, compute_dtype=compute_dtype)
    x = x2.reshape(B, S_t, D)

    return jnp.transpose(x, (1, 0, 2))


# ---------------------------------------------------------------------------
# Pure-JAX reference (mirrors torch MultiheadAttention / LayerNorm semantics)
# ---------------------------------------------------------------------------
def reference_forward(tgt, memory, tgt_mask, memory_mask, p,
                      nhead, num_buckets, eps=1e-5):
    S_t, B, D = tgt.shape
    S_m = memory.shape[0]
    H, Dh = nhead, D // nhead
    hi = jax.lax.Precision.HIGHEST

    def proj(x, w, b):
        return jnp.einsum("lbd,de->lbe", x, w, precision=hi) + b

    def mha(q_in, kv_in, wq, bq, wk, bk, wv, bv, wo, bo, mask_bias):
        Lq, Lk = q_in.shape[0], kv_in.shape[0]
        q = proj(q_in, wq, bq)
        k = proj(kv_in, wk, bk)
        v = proj(kv_in, wv, bv)
        qh = jnp.transpose(q.reshape(Lq, B, H, Dh), (1, 2, 0, 3))
        kh = jnp.transpose(k.reshape(Lk, B, H, Dh), (1, 2, 0, 3))
        vh = jnp.transpose(v.reshape(Lk, B, H, Dh), (1, 2, 0, 3))
        logits = jnp.einsum("bhqd,bhkd->bhqk", qh, kh, precision=hi) / math.sqrt(Dh)
        w = jax.nn.softmax(logits + mask_bias[None], axis=-1)
        o = jnp.einsum("bhqk,bhkd->bhqd", w, vh, precision=hi)
        o = jnp.transpose(o, (2, 0, 1, 3)).reshape(Lq, B, D)
        return proj(o, wo, bo)

    def ln(x, g, b):
        m = jnp.mean(x, -1, keepdims=True)
        v = jnp.mean((x - m) ** 2, -1, keepdims=True)
        return (x - m) / jnp.sqrt(v + eps) * g + b

    bucket_sa = _relative_position_buckets(S_t, S_t, num_buckets)
    bucket_mha = _relative_position_buckets(S_t, S_m, num_buckets)
    bias_sa = jnp.transpose(p["table_sa"][bucket_sa], (2, 0, 1))
    bias_mha = jnp.transpose(p["table_mha"][bucket_mha], (2, 0, 1))

    x = tgt
    sa = mha(x, x,
             p["sa_wqkv"][:, :D], p["sa_bqkv"][:D],
             p["sa_wqkv"][:, D:2 * D], p["sa_bqkv"][D:2 * D],
             p["sa_wqkv"][:, 2 * D:], p["sa_bqkv"][2 * D:],
             p["sa_wo"], p["sa_bo"], tgt_mask[None] + bias_sa)
    x = ln(x + sa, p["ln1_g"], p["ln1_b"])
    ca = mha(x, memory,
             p["ca_wq"], p["ca_bq"],
             p["ca_wkv"][:, :D], p["ca_bkv"][:D],
             p["ca_wkv"][:, D:], p["ca_bkv"][D:],
             p["ca_wo"], p["ca_bo"], memory_mask[None] + bias_mha)
    x = ln(x + ca, p["ln2_g"], p["ln2_b"])
    h = jnp.maximum(jnp.einsum("lbd,df->lbf", x, p["w1"], precision=hi) + p["b1"], 0.0)
    ff = jnp.einsum("lbf,fd->lbd", h, p["w2"], precision=hi) + p["b2"]
    x = ln(x + ff, p["ln3_g"], p["ln3_b"])
    return x


# ---------------------------------------------------------------------------
# Demo / self-check
# ---------------------------------------------------------------------------
if __name__ == "__main__":
    d_model, nhead, num_buckets, dim_ff = 32, 4, 16, 64
    S_t, S_m, B = 8, 12, 2
    D, F, H = d_model, dim_ff, nhead

    key = jax.random.PRNGKey(0)
    ks = jax.random.split(key, 24)

    def nrm(k, shape, scale=1.0):
        return scale * jax.random.normal(k, shape, dtype=jnp.float32)

    params = {
        "sa_wqkv": nrm(ks[0], (D, 3 * D), 1.0 / math.sqrt(D)),
        "sa_bqkv": nrm(ks[1], (3 * D,), 0.1),
        "sa_wo": nrm(ks[2], (D, D), 1.0 / math.sqrt(D)),
        "sa_bo": nrm(ks[3], (D,), 0.1),
        "ca_wq": nrm(ks[4], (D, D), 1.0 / math.sqrt(D)),
        "ca_bq": nrm(ks[5], (D,), 0.1),
        "ca_wkv": nrm(ks[6], (D, 2 * D), 1.0 / math.sqrt(D)),
        "ca_bkv": nrm(ks[7], (2 * D,), 0.1),
        "ca_wo": nrm(ks[8], (D, D), 1.0 / math.sqrt(D)),
        "ca_bo": nrm(ks[9], (D,), 0.1),
        "w1": nrm(ks[10], (D, F), 1.0 / math.sqrt(D)),
        "b1": nrm(ks[11], (F,), 0.1),
        "w2": nrm(ks[12], (F, D), 1.0 / math.sqrt(F)),
        "b2": nrm(ks[13], (D,), 0.1),
        "ln1_g": 1.0 + nrm(ks[14], (D,), 0.1),
        "ln1_b": nrm(ks[15], (D,), 0.1),
        "ln2_g": 1.0 + nrm(ks[16], (D,), 0.1),
        "ln2_b": nrm(ks[17], (D,), 0.1),
        "ln3_g": 1.0 + nrm(ks[18], (D,), 0.1),
        "ln3_b": nrm(ks[19], (D,), 0.1),
        "table_sa": nrm(ks[20], (num_buckets, H), 0.1),
        "table_mha": nrm(ks[21], (num_buckets + 11, H), 0.1),
    }

    tgt = nrm(ks[22], (S_t, B, D))       # (seq, batch, feature) — batch_first=False
    memory = nrm(ks[23], (S_m, B, D))

    # Additive masks (must be tensors: the module adds the relative bias to them).
    causal = jnp.where(jnp.arange(S_t)[:, None] >= jnp.arange(S_t)[None, :],
                       0.0, -1e9).astype(jnp.float32)
    memory_mask = jnp.zeros((S_t, S_m), dtype=jnp.float32)

    ref = reference_forward(tgt, memory, causal, memory_mask, params,
                            nhead, num_buckets)

    # --- f32 operands (exactness check) ---
    fwd_f32 = jax.jit(functools.partial(t5_decoder_layer, nhead=nhead,
                                        num_buckets=num_buckets,
                                        compute_dtype=jnp.float32))
    out = jax.block_until_ready(fwd_f32(tgt, memory, causal, memory_mask, params))
    assert out.shape == (S_t, B, D)
    assert out.dtype == jnp.float32
    max_err = float(jnp.max(jnp.abs(out - ref)))
    assert max_err < 1e-2, f"f32 max abs error too large: {max_err}"

    # --- bf16 MXU operands, f32 accumulation (v6e/v7x fast path) ---
    fwd_bf16 = jax.jit(functools.partial(t5_decoder_layer, nhead=nhead,
                                         num_buckets=num_buckets,
                                         compute_dtype=jnp.bfloat16))
    out_bf16 = jax.block_until_ready(
        fwd_bf16(tgt, memory, causal, memory_mask, params))
    max_err_bf16 = float(jnp.max(jnp.abs(out_bf16 - ref)))
    assert bool(jnp.all(jnp.isfinite(out_bf16)))
    assert max_err_bf16 < 1e-1, f"bf16 max abs error too large: {max_err_bf16}"

    print("KERNEL_OK")
</pallas_src>

<mosaic_0001>
module attributes {stable_mosaic.version = 11 : i64} {
  func.func @_mha_block_kernel(%arg0: i32, %arg1: memref<1x8x32xf32, #tpu.memory_space<vmem>>, %arg2: memref<1x8x32xf32, #tpu.memory_space<vmem>>, %arg3: memref<32x32xf32, #tpu.memory_space<vmem>>, %arg4: memref<1x32xf32, #tpu.memory_space<vmem>>, %arg5: memref<32x64xf32, #tpu.memory_space<vmem>>, %arg6: memref<1x64xf32, #tpu.memory_space<vmem>>, %arg7: memref<32x32xf32, #tpu.memory_space<vmem>>, %arg8: memref<1x32xf32, #tpu.memory_space<vmem>>, %arg9: memref<4x8x8xf32, #tpu.memory_space<vmem>>, %arg10: memref<1x32xf32, #tpu.memory_space<vmem>>, %arg11: memref<1x32xf32, #tpu.memory_space<vmem>>, %arg12: memref<1x8x32xf32, #tpu.memory_space<vmem>>) attributes {dimension_semantics = [#tpu.dimension_semantics<parallel>], iteration_bounds = array<i64: 2>, scalar_prefetch = 0 : i64, scratch_operands = 0 : i64, tpu.core_type = #tpu.core_type<tc>, window_params = [{transform_indices = @transform_0, window_bounds = array<i64: 1, 8, 32>}, {transform_indices = @transform_1, window_bounds = array<i64: 1, 8, 32>}, {pipeline_mode = #tpu.pipeline_mode<synchronous>, transform_indices = @transform_2, window_bounds = array<i64: 32, 32>}, {pipeline_mode = #tpu.pipeline_mode<synchronous>, transform_indices = @transform_3, window_bounds = array<i64: 1, 32>}, {pipeline_mode = #tpu.pipeline_mode<synchronous>, transform_indices = @transform_4, window_bounds = array<i64: 32, 64>}, {pipeline_mode = #tpu.pipeline_mode<synchronous>, transform_indices = @transform_5, window_bounds = array<i64: 1, 64>}, {pipeline_mode = #tpu.pipeline_mode<synchronous>, transform_indices = @transform_6, window_bounds = array<i64: 32, 32>}, {pipeline_mode = #tpu.pipeline_mode<synchronous>, transform_indices = @transform_7, window_bounds = array<i64: 1, 32>}, {pipeline_mode = #tpu.pipeline_mode<synchronous>, transform_indices = @transform_8, window_bounds = array<i64: 4, 8, 8>}, {pipeline_mode = #tpu.pipeline_mode<synchronous>, transform_indices = @transform_9, window_bounds = array<i64: 1, 32>}, {pipeline_mode = #tpu.pipeline_mode<synchronous>, transform_indices = @transform_10, window_bounds = array<i64: 1, 32>}, {transform_indices = @transform_11, window_bounds = array<i64: 1, 8, 32>}]} {
    %c0 = arith.constant 0 : index
    %c0_0 = arith.constant 0 : index
    %c0_1 = arith.constant 0 : index
    %0 = vector.load %arg1[%c0, %c0_0, %c0_1] : memref<1x8x32xf32, #tpu.memory_space<vmem>>, vector<1x8x32xf32>
    %1 = vector.shape_cast %0 : vector<1x8x32xf32> to vector<8x32xf32>
    %c0_2 = arith.constant 0 : index
    %c0_3 = arith.constant 0 : index
    %c0_4 = arith.constant 0 : index
    %2 = vector.load %arg2[%c0_2, %c0_3, %c0_4] : memref<1x8x32xf32, #tpu.memory_space<vmem>>, vector<1x8x32xf32>
    %3 = vector.shape_cast %2 : vector<1x8x32xf32> to vector<8x32xf32>
    %c0_5 = arith.constant 0 : index
    %c0_6 = arith.constant 0 : index
    %4 = vector.load %arg3[%c0_5, %c0_6] : memref<32x32xf32, #tpu.memory_space<vmem>>, vector<32x32xf32>
    %cst = arith.constant dense<0.000000e+00> : vector<8x32xf32>
    %5 = tpu.matmul %1, %4, %cst {dimension_numbers = #tpu.dot_dimension_numbers<[1], [0], [0], [1], [0, 0, 1, 1], [], []>} : vector<8x32xf32>, vector<32x32xf32>, vector<8x32xf32> -> vector<8x32xf32>
    %c0_7 = arith.constant 0 : index
    %c0_8 = arith.constant 0 : index
    %6 = vector.load %arg4[%c0_7, %c0_8] : memref<1x32xf32, #tpu.memory_space<vmem>>, vector<1x32xf32>
    %7 = vector.broadcast %6 : vector<1x32xf32> to vector<8x32xf32>
    %8 = arith.addf %5, %7 : vector<8x32xf32>
    %c0_9 = arith.constant 0 : index
    %c0_10 = arith.constant 0 : index
    %9 = vector.load %arg5[%c0_9, %c0_10] : memref<32x64xf32, #tpu.memory_space<vmem>>, vector<32x64xf32>
    %cst_11 = arith.constant dense<0.000000e+00> : vector<8x64xf32>
    %10 = tpu.matmul %3, %9, %cst_11 {dimension_numbers = #tpu.dot_dimension_numbers<[1], [0], [0], [1], [0, 0, 1, 1], [], []>} : vector<8x32xf32>, vector<32x64xf32>, vector<8x64xf32> -> vector<8x64xf32>
    %c0_12 = arith.constant 0 : index
    %c0_13 = arith.constant 0 : index
    %11 = vector.load %arg6[%c0_12, %c0_13] : memref<1x64xf32, #tpu.memory_space<vmem>>, vector<1x64xf32>
    %12 = vector.broadcast %11 : vector<1x64xf32> to vector<8x64xf32>
    %13 = arith.addf %10, %12 : vector<8x64xf32>
    %14 = vector.extract_strided_slice %13 {offsets = [0, 0], sizes = [8, 32], strides = [1, 1]} : vector<8x64xf32> to vector<8x32xf32>
    %15 = vector.extract_strided_slice %13 {offsets = [0, 32], sizes = [8, 32], strides = [1, 1]} : vector<8x64xf32> to vector<8x32xf32>
    %16 = vector.extract_strided_slice %8 {offsets = [0, 0], sizes = [8, 8], strides = [1, 1]} : vector<8x32xf32> to vector<8x8xf32>
    %17 = vector.extract_strided_slice %14 {offsets = [0, 0], sizes = [8, 8], strides = [1, 1]} : vector<8x32xf32> to vector<8x8xf32>
    %18 = vector.extract_strided_slice %15 {offsets = [0, 0], sizes = [8, 8], strides = [1, 1]} : vector<8x32xf32> to vector<8x8xf32>
    %cst_14 = arith.constant dense<0.000000e+00> : vector<8x8xf32>
    %19 = tpu.matmul %16, %17, %cst_14 {dimension_numbers = #tpu.dot_dimension_numbers<[1], [1], [0], [0], [0, 0, 1, 0], [], []>} : vector<8x8xf32>, vector<8x8xf32>, vector<8x8xf32> -> vector<8x8xf32>
    %cst_15 = arith.constant 0.353553385 : f32
    %20 = vector.broadcast %cst_15 : f32 to vector<8x8xf32>
    %21 = arith.mulf %19, %20 : vector<8x8xf32>
    %c0_16 = arith.constant 0 : index
    %c0_17 = arith.constant 0 : index
    %c0_18 = arith.constant 0 : index
    %22 = vector.load %arg9[%c0_16, %c0_17, %c0_18] : memref<4x8x8xf32, #tpu.memory_space<vmem>>, vector<1x8x8xf32>
    %23 = vector.shape_cast %22 : vector<1x8x8xf32> to vector<8x8xf32>
    %24 = arith.addf %21, %23 : vector<8x8xf32>
    %cst_19 = arith.constant dense<0xFF800000> : vector<8xf32>
    %25 = vector.multi_reduction <maximumf>, %24, %cst_19 [1] : vector<8x8xf32> to vector<8xf32>
    %26 = vector.shape_cast %25 : vector<8xf32> to vector<8x1xf32>
    %27 = vector.broadcast %26 : vector<8x1xf32> to vector<8x8xf32>
    %28 = arith.subf %24, %27 : vector<8x8xf32>
    %29 = math.exp %28 : vector<8x8xf32>
    %cst_20 = arith.constant dense<0.000000e+00> : vector<8xf32>
    %30 = vector.multi_reduction <add>, %29, %cst_20 [1] : vector<8x8xf32> to vector<8xf32>
    %31 = vector.shape_cast %30 : vector<8xf32> to vector<8x1xf32>
    %32 = tpu.reciprocal %31 {approx = true} : vector<8x1xf32> -> vector<8x1xf32>
    %33 = vector.broadcast %32 : vector<8x1xf32> to vector<8x8xf32>
    %34 = arith.mulf %29, %33 : vector<8x8xf32>
    %cst_21 = arith.constant dense<0.000000e+00> : vector<8x8xf32>
    %35 = tpu.matmul %34, %18, %cst_21 {dimension_numbers = #tpu.dot_dimension_numbers<[1], [0], [0], [1], [0, 0, 1, 1], [], []>} : vector<8x8xf32>, vector<8x8xf32>, vector<8x8xf32> -> vector<8x8xf32>
    %36 = vector.extract_strided_slice %8 {offsets = [0, 8], sizes = [8, 8], strides = [1, 1]} : vector<8x32xf32> to vector<8x8xf32>
    %37 = vector.extract_strided_slice %14 {offsets = [0, 8], sizes = [8, 8], strides = [1, 1]} : vector<8x32xf32> to vector<8x8xf32>
    %38 = vector.extract_strided_slice %15 {offsets = [0, 8], sizes = [8, 8], strides = [1, 1]} : vector<8x32xf32> to vector<8x8xf32>
    %cst_22 = arith.constant dense<0.000000e+00> : vector<8x8xf32>
    %39 = tpu.matmul %36, %37, %cst_22 {dimension_numbers = #tpu.dot_dimension_numbers<[1], [1], [0], [0], [0, 0, 1, 0], [], []>} : vector<8x8xf32>, vector<8x8xf32>, vector<8x8xf32> -> vector<8x8xf32>
    %cst_23 = arith.constant 0.353553385 : f32
    %40 = vector.broadcast %cst_23 : f32 to vector<8x8xf32>
    %41 = arith.mulf %39, %40 : vector<8x8xf32>
    %c1 = arith.constant 1 : index
    %c0_24 = arith.constant 0 : index
    %c0_25 = arith.constant 0 : index
    %42 = vector.load %arg9[%c1, %c0_24, %c0_25] : memref<4x8x8xf32, #tpu.memory_space<vmem>>, vector<1x8x8xf32>
    %43 = vector.shape_cast %42 : vector<1x8x8xf32> to vector<8x8xf32>
    %44 = arith.addf %41, %43 : vector<8x8xf32>
    %cst_26 = arith.constant dense<0xFF800000> : vector<8xf32>
    %45 = vector.multi_reduction <maximumf>, %44, %cst_26 [1] : vector<8x8xf32> to vector<8xf32>
    %46 = vector.shape_cast %45 : vector<8xf32> to vector<8x1xf32>
    %47 = vector.broadcast %46 : vector<8x1xf32> to vector<8x8xf32>
    %48 = arith.subf %44, %47 : vector<8x8xf32>
    %49 = math.exp %48 : vector<8x8xf32>
    %cst_27 = arith.constant dense<0.000000e+00> : vector<8xf32>
    %50 = vector.multi_reduction <add>, %49, %cst_27 [1] : vector<8x8xf32> to vector<8xf32>
    %51 = vector.shape_cast %50 : vector<8xf32> to vector<8x1xf32>
    %52 = tpu.reciprocal %51 {approx = true} : vector<8x1xf32> -> vector<8x1xf32>
    %53 = vector.broadcast %52 : vector<8x1xf32> to vector<8x8xf32>
    %54 = arith.mulf %49, %53 : vector<8x8xf32>
    %cst_28 = arith.constant dense<0.000000e+00> : vector<8x8xf32>
    %55 = tpu.matmul %54, %38, %cst_28 {dimension_numbers = #tpu.dot_dimension_numbers<[1], [0], [0], [1], [0, 0, 1, 1], [], []>} : vector<8x8xf32>, vector<8x8xf32>, vector<8x8xf32> -> vector<8x8xf32>
    %56 = vector.extract_strided_slice %8 {offsets = [0, 16], sizes = [8, 8], strides = [1, 1]} : vector<8x32xf32> to vector<8x8xf32>
    %57 = vector.extract_strided_slice %14 {offsets = [0, 16], sizes = [8, 8], strides = [1, 1]} : vector<8x32xf32> to vector<8x8xf32>
    %58 = vector.extract_strided_slice %15 {offsets = [0, 16], sizes = [8, 8], strides = [1, 1]} : vector<8x32xf32> to vector<8x8xf32>
    %cst_29 = arith.constant dense<0.000000e+00> : vector<8x8xf32>
    %59 = tpu.matmul %56, %57, %cst_29 {dimension_numbers = #tpu.dot_dimension_numbers<[1], [1], [0], [0], [0, 0, 1, 0], [], []>} : vector<8x8xf32>, vector<8x8xf32>, vector<8x8xf32> -> vector<8x8xf32>
    %cst_30 = arith.constant 0.353553385 : f32
    %60 = vector.broadcast %cst_30 : f32 to vector<8x8xf32>
    %61 = arith.mulf %59, %60 : vector<8x8xf32>
    %c2 = arith.constant 2 : index
    %c0_31 = arith.constant 0 : index
    %c0_32 = arith.constant 0 : index
    %62 = vector.load %arg9[%c2, %c0_31, %c0_32] : memref<4x8x8xf32, #tpu.memory_space<vmem>>, vector<1x8x8xf32>
    %63 = vector.shape_cast %62 : vector<1x8x8xf32> to vector<8x8xf32>
    %64 = arith.addf %61, %63 : vector<8x8xf32>
    %cst_33 = arith.constant dense<0xFF800000> : vector<8xf32>
    %65 = vector.multi_reduction <maximumf>, %64, %cst_33 [1] : vector<8x8xf32> to vector<8xf32>
    %66 = vector.shape_cast %65 : vector<8xf32> to vector<8x1xf32>
    %67 = vector.broadcast %66 : vector<8x1xf32> to vector<8x8xf32>
    %68 = arith.subf %64, %67 : vector<8x8xf32>
    %69 = math.exp %68 : vector<8x8xf32>
    %cst_34 = arith.constant dense<0.000000e+00> : vector<8xf32>
    %70 = vector.multi_reduction <add>, %69, %cst_34 [1] : vector<8x8xf32> to vector<8xf32>
    %71 = vector.shape_cast %70 : vector<8xf32> to vector<8x1xf32>
    %72 = tpu.reciprocal %71 {approx = true} : vector<8x1xf32> -> vector<8x1xf32>
    %73 = vector.broadcast %72 : vector<8x1xf32> to vector<8x8xf32>
    %74 = arith.mulf %69, %73 : vector<8x8xf32>
    %cst_35 = arith.constant dense<0.000000e+00> : vector<8x8xf32>
    %75 = tpu.matmul %74, %58, %cst_35 {dimension_numbers = #tpu.dot_dimension_numbers<[1], [0], [0], [1], [0, 0, 1, 1], [], []>} : vector<8x8xf32>, vector<8x8xf32>, vector<8x8xf32> -> vector<8x8xf32>
    %76 = vector.extract_strided_slice %8 {offsets = [0, 24], sizes = [8, 8], strides = [1, 1]} : vector<8x32xf32> to vector<8x8xf32>
    %77 = vector.extract_strided_slice %14 {offsets = [0, 24], sizes = [8, 8], strides = [1, 1]} : vector<8x32xf32> to vector<8x8xf32>
    %78 = vector.extract_strided_slice %15 {offsets = [0, 24], sizes = [8, 8], strides = [1, 1]} : vector<8x32xf32> to vector<8x8xf32>
    %cst_36 = arith.constant dense<0.000000e+00> : vector<8x8xf32>
    %79 = tpu.matmul %76, %77, %cst_36 {dimension_numbers = #tpu.dot_dimension_numbers<[1], [1], [0], [0], [0, 0, 1, 0], [], []>} : vector<8x8xf32>, vector<8x8xf32>, vector<8x8xf32> -> vector<8x8xf32>
    %cst_37 = arith.constant 0.353553385 : f32
    %80 = vector.broadcast %cst_37 : f32 to vector<8x8xf32>
    %81 = arith.mulf %79, %80 : vector<8x8xf32>
    %c3 = arith.constant 3 : index
    %c0_38 = arith.constant 0 : index
    %c0_39 = arith.constant 0 : index
    %82 = vector.load %arg9[%c3, %c0_38, %c0_39] : memref<4x8x8xf32, #tpu.memory_space<vmem>>, vector<1x8x8xf32>
    %83 = vector.shape_cast %82 : vector<1x8x8xf32> to vector<8x8xf32>
    %84 = arith.addf %81, %83 : vector<8x8xf32>
    %cst_40 = arith.constant dense<0xFF800000> : vector<8xf32>
    %85 = vector.multi_reduction <maximumf>, %84, %cst_40 [1] : vector<8x8xf32> to vector<8xf32>
    %86 = vector.shape_cast %85 : vector<8xf32> to vector<8x1xf32>
    %87 = vector.broadcast %86 : vector<8x1xf32> to vector<8x8xf32>
    %88 = arith.subf %84, %87 : vector<8x8xf32>
    %89 = math.exp %88 : vector<8x8xf32>
    %cst_41 = arith.constant dense<0.000000e+00> : vector<8xf32>
    %90 = vector.multi_reduction <add>, %89, %cst_41 [1] : vector<8x8xf32> to vector<8xf32>
    %91 = vector.shape_cast %90 : vector<8xf32> to vector<8x1xf32>
    %92 = tpu.reciprocal %91 {approx = true} : vector<8x1xf32> -> vector<8x1xf32>
    %93 = vector.broadcast %92 : vector<8x1xf32> to vector<8x8xf32>
    %94 = arith.mulf %89, %93 : vector<8x8xf32>
    %cst_42 = arith.constant dense<0.000000e+00> : vector<8x8xf32>
    %95 = tpu.matmul %94, %78, %cst_42 {dimension_numbers = #tpu.dot_dimension_numbers<[1], [0], [0], [1], [0, 0, 1, 1], [], []>} : vector<8x8xf32>, vector<8x8xf32>, vector<8x8xf32> -> vector<8x8xf32>
    %96 = tpu.concatenate %35, %55, %75, %95 in 1 : vector<8x8xf32>, vector<8x8xf32>, vector<8x8xf32>, vector<8x8xf32> -> vector<8x32xf32>
    %c0_43 = arith.constant 0 : index
    %c0_44 = arith.constant 0 : index
    %97 = vector.load %arg7[%c0_43, %c0_44] : memref<32x32xf32, #tpu.memory_space<vmem>>, vector<32x32xf32>
    %cst_45 = arith.constant dense<0.000000e+00> : vector<8x32xf32>
    %98 = tpu.matmul %96, %97, %cst_45 {dimension_numbers = #tpu.dot_dimension_numbers<[1], [0], [0], [1], [0, 0, 1, 1], [], []>} : vector<8x32xf32>, vector<32x32xf32>, vector<8x32xf32> -> vector<8x32xf32>
    %c0_46 = arith.constant 0 : index
    %c0_47 = arith.constant 0 : index
    %99 = vector.load %arg8[%c0_46, %c0_47] : memref<1x32xf32, #tpu.memory_space<vmem>>, vector<1x32xf32>
    %100 = vector.broadcast %99 : vector<1x32xf32> to vector<8x32xf32>
    %101 = arith.addf %98, %100 : vector<8x32xf32>
    %102 = arith.addf %1, %101 : vector<8x32xf32>
    %cst_48 = arith.constant dense<0.000000e+00> : vector<8xf32>
    %103 = vector.multi_reduction <add>, %102, %cst_48 [1] : vector<8x32xf32> to vector<8xf32>
    %104 = vector.shape_cast %103 : vector<8xf32> to vector<8x1xf32>
    %cst_49 = arith.constant 3.200000e+01 : f32
    %105 = vector.broadcast %cst_49 : f32 to vector<8x1xf32>
    %106 = arith.divf %104, %105 : vector<8x1xf32>
    %107 = vector.broadcast %106 : vector<8x1xf32> to vector<8x32xf32>
    %108 = arith.subf %102, %107 : vector<8x32xf32>
    %109 = arith.mulf %108, %108 : vector<8x32xf32>
    %cst_50 = arith.constant dense<0.000000e+00> : vector<8xf32>
    %110 = vector.multi_reduction <add>, %109, %cst_50 [1] : vector<8x32xf32> to vector<8xf32>
    %111 = vector.shape_cast %110 : vector<8xf32> to vector<8x1xf32>
    %cst_51 = arith.constant 3.200000e+01 : f32
    %112 = vector.broadcast %cst_51 : f32 to vector<8x1xf32>
    %113 = arith.divf %111, %112 : vector<8x1xf32>
    %cst_52 = arith.constant 9.99999974E-6 : f32
    %114 = vector.broadcast %cst_52 : f32 to vector<8x1xf32>
    %115 = arith.addf %113, %114 : vector<8x1xf32>
    %116 = math.rsqrt %115 : vector<8x1xf32>
    %117 = vector.broadcast %116 : vector<8x1xf32> to vector<8x32xf32>
    %118 = arith.mulf %108, %117 : vector<8x32xf32>
    %c0_53 = arith.constant 0 : index
    %c0_54 = arith.constant 0 : index
    %119 = vector.load %arg10[%c0_53, %c0_54] : memref<1x32xf32, #tpu.memory_space<vmem>>, vector<1x32xf32>
    %120 = vector.broadcast %119 : vector<1x32xf32> to vector<8x32xf32>
    %121 = arith.mulf %118, %120 : vector<8x32xf32>
    %c0_55 = arith.constant 0 : index
    %c0_56 = arith.constant 0 : index
    %122 = vector.load %arg11[%c0_55, %c0_56] : memref<1x32xf32, #tpu.memory_space<vmem>>, vector<1x32xf32>
    %123 = vector.broadcast %122 : vector<1x32xf32> to vector<8x32xf32>
    %124 = arith.addf %121, %123 : vector<8x32xf32>
    %c0_57 = arith.constant 0 : index
    %c0_58 = arith.constant 0 : index
    %c0_59 = arith.constant 0 : index
    %125 = vector.load %arg12[%c0_57, %c0_58, %c0_59] : memref<1x8x32xf32, #tpu.memory_space<vmem>>, vector<1x8x32xf32>
    %126 = vector.shape_cast %125 : vector<1x8x32xf32> to vector<8x32xf32>
    %127 = vector.shape_cast %124 : vector<8x32xf32> to vector<1x8x32xf32>
    tpu.vector_store %arg12[%c0_57, %c0_58, %c0_59], %127 {strides = array<i32>} : memref<1x8x32xf32, #tpu.memory_space<vmem>>, vector<1x8x32xf32>,
    return
  }
  func.func @transform_0(%arg0: i32) -> (i32, i32, i32) {
    %c0_i32 = arith.constant 0 : i32
    %c0_i32_0 = arith.constant 0 : i32
    %c0_i32_1 = arith.constant 0 : i32
    return %arg0, %c0_i32, %c0_i32_0 : i32, i32, i32
  }
  func.func @transform_1(%arg0: i32) -> (i32, i32, i32) {
    %c0_i32 = arith.constant 0 : i32
    %c0_i32_0 = arith.constant 0 : i32
    %c0_i32_1 = arith.constant 0 : i32
    return %arg0, %c0_i32, %c0_i32_0 : i32, i32, i32
  }
  func.func @transform_2(%arg0: i32) -> (i32, i32) {
    %c0_i32 = arith.constant 0 : i32
    %c0_i32_0 = arith.constant 0 : i32
    %c0_i32_1 = arith.constant 0 : i32
    return %c0_i32, %c0_i32_0 : i32, i32
  }
  func.func @transform_3(%arg0: i32) -> (i32, i32) {
    %c0_i32 = arith.constant 0 : i32
    %c0_i32_0 = arith.constant 0 : i32
    %c0_i32_1 = arith.constant 0 : i32
    return %c0_i32, %c0_i32_0 : i32, i32
  }
  func.func @transform_4(%arg0: i32) -> (i32, i32) {
    %c0_i32 = arith.constant 0 : i32
    %c0_i32_0 = arith.constant 0 : i32
    %c0_i32_1 = arith.constant 0 : i32
    return %c0_i32, %c0_i32_0 : i32, i32
  }
  func.func @transform_5(%arg0: i32) -> (i32, i32) {
    %c0_i32 = arith.constant 0 : i32
    %c0_i32_0 = arith.constant 0 : i32
    %c0_i32_1 = arith.constant 0 : i32
    return %c0_i32, %c0_i32_0 : i32, i32
  }
  func.func @transform_6(%arg0: i32) -> (i32, i32) {
    %c0_i32 = arith.constant 0 : i32
    %c0_i32_0 = arith.constant 0 : i32
    %c0_i32_1 = arith.constant 0 : i32
    return %c0_i32, %c0_i32_0 : i32, i32
  }
  func.func @transform_7(%arg0: i32) -> (i32, i32) {
    %c0_i32 = arith.constant 0 : i32
    %c0_i32_0 = arith.constant 0 : i32
    %c0_i32_1 = arith.constant 0 : i32
    return %c0_i32, %c0_i32_0 : i32, i32
  }
  func.func @transform_8(%arg0: i32) -> (i32, i32, i32) {
    %c0_i32 = arith.constant 0 : i32
    %c0_i32_0 = arith.constant 0 : i32
    %c0_i32_1 = arith.constant 0 : i32
    %c0_i32_2 = arith.constant 0 : i32
    return %c0_i32, %c0_i32_0, %c0_i32_1 : i32, i32, i32
  }
  func.func @transform_9(%arg0: i32) -> (i32, i32) {
    %c0_i32 = arith.constant 0 : i32
    %c0_i32_0 = arith.constant 0 : i32
    %c0_i32_1 = arith.constant 0 : i32
    return %c0_i32, %c0_i32_0 : i32, i32
  }
  func.func @transform_10(%arg0: i32) -> (i32, i32) {
    %c0_i32 = arith.constant 0 : i32
    %c0_i32_0 = arith.constant 0 : i32
    %c0_i32_1 = arith.constant 0 : i32
    return %c0_i32, %c0_i32_0 : i32, i32
  }
  func.func @transform_11(%arg0: i32) -> (i32, i32, i32) {
    %c0_i32 = arith.constant 0 : i32
    %c0_i32_0 = arith.constant 0 : i32
    %c0_i32_1 = arith.constant 0 : i32
    return %arg0, %c0_i32, %c0_i32_0 : i32, i32, i32
  }
}

module attributes {stable_mosaic.version = 11 : i64} {
  func.func @_mha_block_kernel(%arg0: i32, %arg1: memref<1x8x32xf32, #tpu.memory_space<vmem>>, %arg2: memref<1x12x32xf32, #tpu.memory_space<vmem>>, %arg3: memref<32x32xf32, #tpu.memory_space<vmem>>, %arg4: memref<1x32xf32, #tpu.memory_space<vmem>>, %arg5: memref<32x64xf32, #tpu.memory_space<vmem>>, %arg6: memref<1x64xf32, #tpu.memory_space<vmem>>, %arg7: memref<32x32xf32, #tpu.memory_space<vmem>>, %arg8: memref<1x32xf32, #tpu.memory_space<vmem>>, %arg9: memref<4x8x12xf32, #tpu.memory_space<vmem>>, %arg10: memref<1x32xf32, #tpu.memory_space<vmem>>, %arg11: memref<1x32xf32, #tpu.memory_space<vmem>>, %arg12: memref<1x8x32xf32, #tpu.memory_space<vmem>>) attributes {dimension_semantics = [#tpu.dimension_semantics<parallel>], iteration_bounds = array<i64: 2>, scalar_prefetch = 0 : i64, scratch_operands = 0 : i64, tpu.core_type = #tpu.core_type<tc>, window_params = [{transform_indices = @transform_0, window_bounds = array<i64: 1, 8, 32>}, {transform_indices = @transform_1, window_bounds = array<i64: 1, 12, 32>}, {pipeline_mode = #tpu.pipeline_mode<synchronous>, transform_indices = @transform_2, window_bounds = array<i64: 32, 32>}, {pipeline_mode = #tpu.pipeline_mode<synchronous>, transform_indices = @transform_3, window_bounds = array<i64: 1, 32>}, {pipeline_mode = #tpu.pipeline_mode<synchronous>, transform_indices = @transform_4, window_bounds = array<i64: 32, 64>}, {pipeline_mode = #tpu.pipeline_mode<synchronous>, transform_indices = @transform_5, window_bounds = array<i64: 1, 64>}, {pipeline_mode = #tpu.pipeline_mode<synchronous>, transform_indices = @transform_6, window_bounds = array<i64: 32, 32>}, {pipeline_mode = #tpu.pipeline_mode<synchronous>, transform_indices = @transform_7, window_bounds = array<i64: 1, 32>}, {pipeline_mode = #tpu.pipeline_mode<synchronous>, transform_indices = @transform_8, window_bounds = array<i64: 4, 8, 12>}, {pipeline_mode = #tpu.pipeline_mode<synchronous>, transform_indices = @transform_9, window_bounds = array<i64: 1, 32>}, {pipeline_mode = #tpu.pipeline_mode<synchronous>, transform_indices = @transform_10, window_bounds = array<i64: 1, 32>}, {transform_indices = @transform_11, window_bounds = array<i64: 1, 8, 32>}]} {
    %c0 = arith.constant 0 : index
    %c0_0 = arith.constant 0 : index
    %c0_1 = arith.constant 0 : index
    %0 = vector.load %arg1[%c0, %c0_0, %c0_1] : memref<1x8x32xf32, #tpu.memory_space<vmem>>, vector<1x8x32xf32>
    %1 = vector.shape_cast %0 : vector<1x8x32xf32> to vector<8x32xf32>
    %c0_2 = arith.constant 0 : index
    %c0_3 = arith.constant 0 : index
    %c0_4 = arith.constant 0 : index
    %2 = vector.load %arg2[%c0_2, %c0_3, %c0_4] : memref<1x12x32xf32, #tpu.memory_space<vmem>>, vector<1x12x32xf32>
    %3 = vector.shape_cast %2 : vector<1x12x32xf32> to vector<12x32xf32>
    %c0_5 = arith.constant 0 : index
    %c0_6 = arith.constant 0 : index
    %4 = vector.load %arg3[%c0_5, %c0_6] : memref<32x32xf32, #tpu.memory_space<vmem>>, vector<32x32xf32>
    %cst = arith.constant dense<0.000000e+00> : vector<8x32xf32>
    %5 = tpu.matmul %1, %4, %cst {dimension_numbers = #tpu.dot_dimension_numbers<[1], [0], [0], [1], [0, 0, 1, 1], [], []>} : vector<8x32xf32>, vector<32x32xf32>, vector<8x32xf32> -> vector<8x32xf32>
    %c0_7 = arith.constant 0 : index
    %c0_8 = arith.constant 0 : index
    %6 = vector.load %arg4[%c0_7, %c0_8] : memref<1x32xf32, #tpu.memory_space<vmem>>, vector<1x32xf32>
    %7 = vector.broadcast %6 : vector<1x32xf32> to vector<8x32xf32>
    %8 = arith.addf %5, %7 : vector<8x32xf32>
    %c0_9 = arith.constant 0 : index
    %c0_10 = arith.constant 0 : index
    %9 = vector.load %arg5[%c0_9, %c0_10] : memref<32x64xf32, #tpu.memory_space<vmem>>, vector<32x64xf32>
    %cst_11 = arith.constant dense<0.000000e+00> : vector<12x64xf32>
    %10 = tpu.matmul %3, %9, %cst_11 {dimension_numbers = #tpu.dot_dimension_numbers<[1], [0], [0], [1], [0, 0, 1, 1], [], []>} : vector<12x32xf32>, vector<32x64xf32>, vector<12x64xf32> -> vector<12x64xf32>
    %c0_12 = arith.constant 0 : index
    %c0_13 = arith.constant 0 : index
    %11 = vector.load %arg6[%c0_12, %c0_13] : memref<1x64xf32, #tpu.memory_space<vmem>>, vector<1x64xf32>
    %12 = vector.broadcast %11 : vector<1x64xf32> to vector<12x64xf32>
    %13 = arith.addf %10, %12 : vector<12x64xf32>
    %14 = vector.extract_strided_slice %13 {offsets = [0, 0], sizes = [12, 32], strides = [1, 1]} : vector<12x64xf32> to vector<12x32xf32>
    %15 = vector.extract_strided_slice %13 {offsets = [0, 32], sizes = [12, 32], strides = [1, 1]} : vector<12x64xf32> to vector<12x32xf32>
    %16 = vector.extract_strided_slice %8 {offsets = [0, 0], sizes = [8, 8], strides = [1, 1]} : vector<8x32xf32> to vector<8x8xf32>
    %17 = vector.extract_strided_slice %14 {offsets = [0, 0], sizes = [12, 8], strides = [1, 1]} : vector<12x32xf32> to vector<12x8xf32>
    %18 = vector.extract_strided_slice %15 {offsets = [0, 0], sizes = [12, 8], strides = [1, 1]} : vector<12x32xf32> to vector<12x8xf32>
    %cst_14 = arith.constant dense<0.000000e+00> : vector<8x12xf32>
    %19 = tpu.matmul %16, %17, %cst_14 {dimension_numbers = #tpu.dot_dimension_numbers<[1], [1], [0], [0], [0, 0, 1, 0], [], []>} : vector<8x8xf32>, vector<12x8xf32>, vector<8x12xf32> -> vector<8x12xf32>
    %cst_15 = arith.constant 0.353553385 : f32
    %20 = vector.broadcast %cst_15 : f32 to vector<8x12xf32>
    %21 = arith.mulf %19, %20 : vector<8x12xf32>
    %c0_16 = arith.constant 0 : index
    %c0_17 = arith.constant 0 : index
    %c0_18 = arith.constant 0 : index
    %22 = vector.load %arg9[%c0_16, %c0_17, %c0_18] : memref<4x8x12xf32, #tpu.memory_space<vmem>>, vector<1x8x12xf32>
    %23 = vector.shape_cast %22 : vector<1x8x12xf32> to vector<8x12xf32>
    %24 = arith.addf %21, %23 : vector<8x12xf32>
    %cst_19 = arith.constant dense<0xFF800000> : vector<8xf32>
    %25 = vector.multi_reduction <maximumf>, %24, %cst_19 [1] : vector<8x12xf32> to vector<8xf32>
    %26 = vector.shape_cast %25 : vector<8xf32> to vector<8x1xf32>
    %27 = vector.broadcast %26 : vector<8x1xf32> to vector<8x12xf32>
    %28 = arith.subf %24, %27 : vector<8x12xf32>
    %29 = math.exp %28 : vector<8x12xf32>
    %cst_20 = arith.constant dense<0.000000e+00> : vector<8xf32>
    %30 = vector.multi_reduction <add>, %29, %cst_20 [1] : vector<8x12xf32> to vector<8xf32>
    %31 = vector.shape_cast %30 : vector<8xf32> to vector<8x1xf32>
    %32 = tpu.reciprocal %31 {approx = true} : vector<8x1xf32> -> vector<8x1xf32>
    %33 = vector.broadcast %32 : vector<8x1xf32> to vector<8x12xf32>
    %34 = arith.mulf %29, %33 : vector<8x12xf32>
    %cst_21 = arith.constant dense<0.000000e+00> : vector<8x8xf32>
    %35 = tpu.matmul %34, %18, %cst_21 {dimension_numbers = #tpu.dot_dimension_numbers<[1], [0], [0], [1], [0, 0, 1, 1], [], []>} : vector<8x12xf32>, vector<12x8xf32>, vector<8x8xf32> -> vector<8x8xf32>
    %36 = vector.extract_strided_slice %8 {offsets = [0, 8], sizes = [8, 8], strides = [1, 1]} : vector<8x32xf32> to vector<8x8xf32>
    %37 = vector.extract_strided_slice %14 {offsets = [0, 8], sizes = [12, 8], strides = [1, 1]} : vector<12x32xf32> to vector<12x8xf32>
    %38 = vector.extract_strided_slice %15 {offsets = [0, 8], sizes = [12, 8], strides = [1, 1]} : vector<12x32xf32> to vector<12x8xf32>
    %cst_22 = arith.constant dense<0.000000e+00> : vector<8x12xf32>
    %39 = tpu.matmul %36, %37, %cst_22 {dimension_numbers = #tpu.dot_dimension_numbers<[1], [1], [0], [0], [0, 0, 1, 0], [], []>} : vector<8x8xf32>, vector<12x8xf32>, vector<8x12xf32> -> vector<8x12xf32>
    %cst_23 = arith.constant 0.353553385 : f32
    %40 = vector.broadcast %cst_23 : f32 to vector<8x12xf32>
    %41 = arith.mulf %39, %40 : vector<8x12xf32>
    %c1 = arith.constant 1 : index
    %c0_24 = arith.constant 0 : index
    %c0_25 = arith.constant 0 : index
    %42 = vector.load %arg9[%c1, %c0_24, %c0_25] : memref<4x8x12xf32, #tpu.memory_space<vmem>>, vector<1x8x12xf32>
    %43 = vector.shape_cast %42 : vector<1x8x12xf32> to vector<8x12xf32>
    %44 = arith.addf %41, %43 : vector<8x12xf32>
    %cst_26 = arith.constant dense<0xFF800000> : vector<8xf32>
    %45 = vector.multi_reduction <maximumf>, %44, %cst_26 [1] : vector<8x12xf32> to vector<8xf32>
    %46 = vector.shape_cast %45 : vector<8xf32> to vector<8x1xf32>
    %47 = vector.broadcast %46 : vector<8x1xf32> to vector<8x12xf32>
    %48 = arith.subf %44, %47 : vector<8x12xf32>
    %49 = math.exp %48 : vector<8x12xf32>
    %cst_27 = arith.constant dense<0.000000e+00> : vector<8xf32>
    %50 = vector.multi_reduction <add>, %49, %cst_27 [1] : vector<8x12xf32> to vector<8xf32>
    %51 = vector.shape_cast %50 : vector<8xf32> to vector<8x1xf32>
    %52 = tpu.reciprocal %51 {approx = true} : vector<8x1xf32> -> vector<8x1xf32>
    %53 = vector.broadcast %52 : vector<8x1xf32> to vector<8x12xf32>
    %54 = arith.mulf %49, %53 : vector<8x12xf32>
    %cst_28 = arith.constant dense<0.000000e+00> : vector<8x8xf32>
    %55 = tpu.matmul %54, %38, %cst_28 {dimension_numbers = #tpu.dot_dimension_numbers<[1], [0], [0], [1], [0, 0, 1, 1], [], []>} : vector<8x12xf32>, vector<12x8xf32>, vector<8x8xf32> -> vector<8x8xf32>
    %56 = vector.extract_strided_slice %8 {offsets = [0, 16], sizes = [8, 8], strides = [1, 1]} : vector<8x32xf32> to vector<8x8xf32>
    %57 = vector.extract_strided_slice %14 {offsets = [0, 16], sizes = [12, 8], strides = [1, 1]} : vector<12x32xf32> to vector<12x8xf32>
    %58 = vector.extract_strided_slice %15 {offsets = [0, 16], sizes = [12, 8], strides = [1, 1]} : vector<12x32xf32> to vector<12x8xf32>
    %cst_29 = arith.constant dense<0.000000e+00> : vector<8x12xf32>
    %59 = tpu.matmul %56, %57, %cst_29 {dimension_numbers = #tpu.dot_dimension_numbers<[1], [1], [0], [0], [0, 0, 1, 0], [], []>} : vector<8x8xf32>, vector<12x8xf32>, vector<8x12xf32> -> vector<8x12xf32>
    %cst_30 = arith.constant 0.353553385 : f32
    %60 = vector.broadcast %cst_30 : f32 to vector<8x12xf32>
    %61 = arith.mulf %59, %60 : vector<8x12xf32>
    %c2 = arith.constant 2 : index
    %c0_31 = arith.constant 0 : index
    %c0_32 = arith.constant 0 : index
    %62 = vector.load %arg9[%c2, %c0_31, %c0_32] : memref<4x8x12xf32, #tpu.memory_space<vmem>>, vector<1x8x12xf32>
    %63 = vector.shape_cast %62 : vector<1x8x12xf32> to vector<8x12xf32>
    %64 = arith.addf %61, %63 : vector<8x12xf32>
    %cst_33 = arith.constant dense<0xFF800000> : vector<8xf32>
    %65 = vector.multi_reduction <maximumf>, %64, %cst_33 [1] : vector<8x12xf32> to vector<8xf32>
    %66 = vector.shape_cast %65 : vector<8xf32> to vector<8x1xf32>
    %67 = vector.broadcast %66 : vector<8x1xf32> to vector<8x12xf32>
    %68 = arith.subf %64, %67 : vector<8x12xf32>
    %69 = math.exp %68 : vector<8x12xf32>
    %cst_34 = arith.constant dense<0.000000e+00> : vector<8xf32>
    %70 = vector.multi_reduction <add>, %69, %cst_34 [1] : vector<8x12xf32> to vector<8xf32>
    %71 = vector.shape_cast %70 : vector<8xf32> to vector<8x1xf32>
    %72 = tpu.reciprocal %71 {approx = true} : vector<8x1xf32> -> vector<8x1xf32>
    %73 = vector.broadcast %72 : vector<8x1xf32> to vector<8x12xf32>
    %74 = arith.mulf %69, %73 : vector<8x12xf32>
    %cst_35 = arith.constant dense<0.000000e+00> : vector<8x8xf32>
    %75 = tpu.matmul %74, %58, %cst_35 {dimension_numbers = #tpu.dot_dimension_numbers<[1], [0], [0], [1], [0, 0, 1, 1], [], []>} : vector<8x12xf32>, vector<12x8xf32>, vector<8x8xf32> -> vector<8x8xf32>
    %76 = vector.extract_strided_slice %8 {offsets = [0, 24], sizes = [8, 8], strides = [1, 1]} : vector<8x32xf32> to vector<8x8xf32>
    %77 = vector.extract_strided_slice %14 {offsets = [0, 24], sizes = [12, 8], strides = [1, 1]} : vector<12x32xf32> to vector<12x8xf32>
    %78 = vector.extract_strided_slice %15 {offsets = [0, 24], sizes = [12, 8], strides = [1, 1]} : vector<12x32xf32> to vector<12x8xf32>
    %cst_36 = arith.constant dense<0.000000e+00> : vector<8x12xf32>
    %79 = tpu.matmul %76, %77, %cst_36 {dimension_numbers = #tpu.dot_dimension_numbers<[1], [1], [0], [0], [0, 0, 1, 0], [], []>} : vector<8x8xf32>, vector<12x8xf32>, vector<8x12xf32> -> vector<8x12xf32>
    %cst_37 = arith.constant 0.353553385 : f32
    %80 = vector.broadcast %cst_37 : f32 to vector<8x12xf32>
    %81 = arith.mulf %79, %80 : vector<8x12xf32>
    %c3 = arith.constant 3 : index
    %c0_38 = arith.constant 0 : index
    %c0_39 = arith.constant 0 : index
    %82 = vector.load %arg9[%c3, %c0_38, %c0_39] : memref<4x8x12xf32, #tpu.memory_space<vmem>>, vector<1x8x12xf32>
    %83 = vector.shape_cast %82 : vector<1x8x12xf32> to vector<8x12xf32>
    %84 = arith.addf %81, %83 : vector<8x12xf32>
    %cst_40 = arith.constant dense<0xFF800000> : vector<8xf32>
    %85 = vector.multi_reduction <maximumf>, %84, %cst_40 [1] : vector<8x12xf32> to vector<8xf32>
    %86 = vector.shape_cast %85 : vector<8xf32> to vector<8x1xf32>
    %87 = vector.broadcast %86 : vector<8x1xf32> to vector<8x12xf32>
    %88 = arith.subf %84, %87 : vector<8x12xf32>
    %89 = math.exp %88 : vector<8x12xf32>
    %cst_41 = arith.constant dense<0.000000e+00> : vector<8xf32>
    %90 = vector.multi_reduction <add>, %89, %cst_41 [1] : vector<8x12xf32> to vector<8xf32>
    %91 = vector.shape_cast %90 : vector<8xf32> to vector<8x1xf32>
    %92 = tpu.reciprocal %91 {approx = true} : vector<8x1xf32> -> vector<8x1xf32>
    %93 = vector.broadcast %92 : vector<8x1xf32> to vector<8x12xf32>
    %94 = arith.mulf %89, %93 : vector<8x12xf32>
    %cst_42 = arith.constant dense<0.000000e+00> : vector<8x8xf32>
    %95 = tpu.matmul %94, %78, %cst_42 {dimension_numbers = #tpu.dot_dimension_numbers<[1], [0], [0], [1], [0, 0, 1, 1], [], []>} : vector<8x12xf32>, vector<12x8xf32>, vector<8x8xf32> -> vector<8x8xf32>
    %96 = tpu.concatenate %35, %55, %75, %95 in 1 : vector<8x8xf32>, vector<8x8xf32>, vector<8x8xf32>, vector<8x8xf32> -> vector<8x32xf32>
    %c0_43 = arith.constant 0 : index
    %c0_44 = arith.constant 0 : index
    %97 = vector.load %arg7[%c0_43, %c0_44] : memref<32x32xf32, #tpu.memory_space<vmem>>, vector<32x32xf32>
    %cst_45 = arith.constant dense<0.000000e+00> : vector<8x32xf32>
    %98 = tpu.matmul %96, %97, %cst_45 {dimension_numbers = #tpu.dot_dimension_numbers<[1], [0], [0], [1], [0, 0, 1, 1], [], []>} : vector<8x32xf32>, vector<32x32xf32>, vector<8x32xf32> -> vector<8x32xf32>
    %c0_46 = arith.constant 0 : index
    %c0_47 = arith.constant 0 : index
    %99 = vector.load %arg8[%c0_46, %c0_47] : memref<1x32xf32, #tpu.memory_space<vmem>>, vector<1x32xf32>
    %100 = vector.broadcast %99 : vector<1x32xf32> to vector<8x32xf32>
    %101 = arith.addf %98, %100 : vector<8x32xf32>
    %102 = arith.addf %1, %101 : vector<8x32xf32>
    %cst_48 = arith.constant dense<0.000000e+00> : vector<8xf32>
    %103 = vector.multi_reduction <add>, %102, %cst_48 [1] : vector<8x32xf32> to vector<8xf32>
    %104 = vector.shape_cast %103 : vector<8xf32> to vector<8x1xf32>
    %cst_49 = arith.constant 3.200000e+01 : f32
    %105 = vector.broadcast %cst_49 : f32 to vector<8x1xf32>
    %106 = arith.divf %104, %105 : vector<8x1xf32>
    %107 = vector.broadcast %106 : vector<8x1xf32> to vector<8x32xf32>
    %108 = arith.subf %102, %107 : vector<8x32xf32>
    %109 = arith.mulf %108, %108 : vector<8x32xf32>
    %cst_50 = arith.constant dense<0.000000e+00> : vector<8xf32>
    %110 = vector.multi_reduction <add>, %109, %cst_50 [1] : vector<8x32xf32> to vector<8xf32>
    %111 = vector.shape_cast %110 : vector<8xf32> to vector<8x1xf32>
    %cst_51 = arith.constant 3.200000e+01 : f32
    %112 = vector.broadcast %cst_51 : f32 to vector<8x1xf32>
    %113 = arith.divf %111, %112 : vector<8x1xf32>
    %cst_52 = arith.constant 9.99999974E-6 : f32
    %114 = vector.broadcast %cst_52 : f32 to vector<8x1xf32>
    %115 = arith.addf %113, %114 : vector<8x1xf32>
    %116 = math.rsqrt %115 : vector<8x1xf32>
    %117 = vector.broadcast %116 : vector<8x1xf32> to vector<8x32xf32>
    %118 = arith.mulf %108, %117 : vector<8x32xf32>
    %c0_53 = arith.constant 0 : index
    %c0_54 = arith.constant 0 : index
    %119 = vector.load %arg10[%c0_53, %c0_54] : memref<1x32xf32, #tpu.memory_space<vmem>>, vector<1x32xf32>
    %120 = vector.broadcast %119 : vector<1x32xf32> to vector<8x32xf32>
    %121 = arith.mulf %118, %120 : vector<8x32xf32>
    %c0_55 = arith.constant 0 : index
    %c0_56 = arith.constant 0 : index
    %122 = vector.load %arg11[%c0_55, %c0_56] : memref<1x32xf32, #tpu.memory_space<vmem>>, vector<1x32xf32>
    %123 = vector.broadcast %122 : vector<1x32xf32> to vector<8x32xf32>
    %124 = arith.addf %121, %123 : vector<8x32xf32>
    %c0_57 = arith.constant 0 : index
    %c0_58 = arith.constant 0 : index
    %c0_59 = arith.constant 0 : index
    %125 = vector.load %arg12[%c0_57, %c0_58, %c0_59] : memref<1x8x32xf32, #tpu.memory_space<vmem>>, vector<1x8x32xf32>
    %126 = vector.shape_cast %125 : vector<1x8x32xf32> to vector<8x32xf32>
    %127 = vector.shape_cast %124 : vector<8x32xf32> to vector<1x8x32xf32>
    tpu.vector_store %arg12[%c0_57, %c0_58, %c0_59], %127 {strides = array<i32>} : memref<1x8x32xf32, #tpu.memory_space<vmem>>, vector<1x8x32xf32>,
    return
  }
  func.func @transform_0(%arg0: i32) -> (i32, i32, i32) {
    %c0_i32 = arith.constant 0 : i32
    %c0_i32_0 = arith.constant 0 : i32
    %c0_i32_1 = arith.constant 0 : i32
    return %arg0, %c0_i32, %c0_i32_0 : i32, i32, i32
  }
  func.func @transform_1(%arg0: i32) -> (i32, i32, i32) {
    %c0_i32 = arith.constant 0 : i32
    %c0_i32_0 = arith.constant 0 : i32
    %c0_i32_1 = arith.constant 0 : i32
    return %arg0, %c0_i32, %c0_i32_0 : i32, i32, i32
  }
  func.func @transform_2(%arg0: i32) -> (i32, i32) {
    %c0_i32 = arith.constant 0 : i32
    %c0_i32_0 = arith.constant 0 : i32
    %c0_i32_1 = arith.constant 0 : i32
    return %c0_i32, %c0_i32_0 : i32, i32
  }
  func.func @transform_3(%arg0: i32) -> (i32, i32) {
    %c0_i32 = arith.constant 0 : i32
    %c0_i32_0 = arith.constant 0 : i32
    %c0_i32_1 = arith.constant 0 : i32
    return %c0_i32, %c0_i32_0 : i32, i32
  }
  func.func @transform_4(%arg0: i32) -> (i32, i32) {
    %c0_i32 = arith.constant 0 : i32
    %c0_i32_0 = arith.constant 0 : i32
    %c0_i32_1 = arith.constant 0 : i32
    return %c0_i32, %c0_i32_0 : i32, i32
  }
  func.func @transform_5(%arg0: i32) -> (i32, i32) {
    %c0_i32 = arith.constant 0 : i32
    %c0_i32_0 = arith.constant 0 : i32
    %c0_i32_1 = arith.constant 0 : i32
    return %c0_i32, %c0_i32_0 : i32, i32
  }
  func.func @transform_6(%arg0: i32) -> (i32, i32) {
    %c0_i32 = arith.constant 0 : i32
    %c0_i32_0 = arith.constant 0 : i32
    %c0_i32_1 = arith.constant 0 : i32
    return %c0_i32, %c0_i32_0 : i32, i32
  }
  func.func @transform_7(%arg0: i32) -> (i32, i32) {
    %c0_i32 = arith.constant 0 : i32
    %c0_i32_0 = arith.constant 0 : i32
    %c0_i32_1 = arith.constant 0 : i32
    return %c0_i32, %c0_i32_0 : i32, i32
  }
  func.func @transform_8(%arg0: i32) -> (i32, i32, i32) {
    %c0_i32 = arith.constant 0 : i32
    %c0_i32_0 = arith.constant 0 : i32
    %c0_i32_1 = arith.constant 0 : i32
    %c0_i32_2 = arith.constant 0 : i32
    return %c0_i32, %c0_i32_0, %c0_i32_1 : i32, i32, i32
  }
  func.func @transform_9(%arg0: i32) -> (i32, i32) {
    %c0_i32 = arith.constant 0 : i32
    %c0_i32_0 = arith.constant 0 : i32
    %c0_i32_1 = arith.constant 0 : i32
    return %c0_i32, %c0_i32_0 : i32, i32
  }
  func.func @transform_10(%arg0: i32) -> (i32, i32) {
    %c0_i32 = arith.constant 0 : i32
    %c0_i32_0 = arith.constant 0 : i32
    %c0_i32_1 = arith.constant 0 : i32
    return %c0_i32, %c0_i32_0 : i32, i32
  }
  func.func @transform_11(%arg0: i32) -> (i32, i32, i32) {
    %c0_i32 = arith.constant 0 : i32
    %c0_i32_0 = arith.constant 0 : i32
    %c0_i32_1 = arith.constant 0 : i32
    return %arg0, %c0_i32, %c0_i32_0 : i32, i32, i32
  }
}

module attributes {stable_mosaic.version = 11 : i64} {
  func.func @_ffn_block_kernel(%arg0: i32, %arg1: memref<16x32xf32, #tpu.memory_space<vmem>>, %arg2: memref<32x64xf32, #tpu.memory_space<vmem>>, %arg3: memref<1x64xf32, #tpu.memory_space<vmem>>, %arg4: memref<64x32xf32, #tpu.memory_space<vmem>>, %arg5: memref<1x32xf32, #tpu.memory_space<vmem>>, %arg6: memref<1x32xf32, #tpu.memory_space<vmem>>, %arg7: memref<1x32xf32, #tpu.memory_space<vmem>>, %arg8: memref<16x32xf32, #tpu.memory_space<vmem>>) attributes {dimension_semantics = [#tpu.dimension_semantics<parallel>], iteration_bounds = array<i64: 1>, scalar_prefetch = 0 : i64, scratch_operands = 0 : i64, tpu.core_type = #tpu.core_type<tc>, window_params = [{transform_indices = @transform_0, window_bounds = array<i64: 16, 32>}, {pipeline_mode = #tpu.pipeline_mode<synchronous>, transform_indices = @transform_1, window_bounds = array<i64: 32, 64>}, {pipeline_mode = #tpu.pipeline_mode<synchronous>, transform_indices = @transform_2, window_bounds = array<i64: 1, 64>}, {pipeline_mode = #tpu.pipeline_mode<synchronous>, transform_indices = @transform_3, window_bounds = array<i64: 64, 32>}, {pipeline_mode = #tpu.pipeline_mode<synchronous>, transform_indices = @transform_4, window_bounds = array<i64: 1, 32>}, {pipeline_mode = #tpu.pipeline_mode<synchronous>, transform_indices = @transform_5, window_bounds = array<i64: 1, 32>}, {pipeline_mode = #tpu.pipeline_mode<synchronous>, transform_indices = @transform_6, window_bounds = array<i64: 1, 32>}, {transform_indices = @transform_7, window_bounds = array<i64: 16, 32>}]} {
    %c0 = arith.constant 0 : index
    %c0_0 = arith.constant 0 : index
    %0 = vector.load %arg1[%c0, %c0_0] : memref<16x32xf32, #tpu.memory_space<vmem>>, vector<16x32xf32>
    %c0_1 = arith.constant 0 : index
    %c0_2 = arith.constant 0 : index
    %1 = vector.load %arg2[%c0_1, %c0_2] : memref<32x64xf32, #tpu.memory_space<vmem>>, vector<32x64xf32>
    %cst = arith.constant dense<0.000000e+00> : vector<16x64xf32>
    %2 = tpu.matmul %0, %1, %cst {dimension_numbers = #tpu.dot_dimension_numbers<[1], [0], [0], [1], [0, 0, 1, 1], [], []>} : vector<16x32xf32>, vector<32x64xf32>, vector<16x64xf32> -> vector<16x64xf32>
    %c0_3 = arith.constant 0 : index
    %c0_4 = arith.constant 0 : index
    %3 = vector.load %arg3[%c0_3, %c0_4] : memref<1x64xf32, #tpu.memory_space<vmem>>, vector<1x64xf32>
    %4 = vector.broadcast %3 : vector<1x64xf32> to vector<16x64xf32>
    %5 = arith.addf %2, %4 : vector<16x64xf32>
    %cst_5 = arith.constant 0.000000e+00 : f32
    %6 = vector.broadcast %cst_5 : f32 to vector<16x64xf32>
    %7 = arith.maximumf %5, %6 : vector<16x64xf32>
    %c0_6 = arith.constant 0 : index
    %c0_7 = arith.constant 0 : index
    %8 = vector.load %arg4[%c0_6, %c0_7] : memref<64x32xf32, #tpu.memory_space<vmem>>, vector<64x32xf32>
    %cst_8 = arith.constant dense<0.000000e+00> : vector<16x32xf32>
    %9 = tpu.matmul %7, %8, %cst_8 {dimension_numbers = #tpu.dot_dimension_numbers<[1], [0], [0], [1], [0, 0, 1, 1], [], []>} : vector<16x64xf32>, vector<64x32xf32>, vector<16x32xf32> -> vector<16x32xf32>
    %c0_9 = arith.constant 0 : index
    %c0_10 = arith.constant 0 : index
    %10 = vector.load %arg5[%c0_9, %c0_10] : memref<1x32xf32, #tpu.memory_space<vmem>>, vector<1x32xf32>
    %11 = vector.broadcast %10 : vector<1x32xf32> to vector<16x32xf32>
    %12 = arith.addf %9, %11 : vector<16x32xf32>
    %13 = arith.addf %0, %12 : vector<16x32xf32>
    %cst_11 = arith.constant dense<0.000000e+00> : vector<16xf32>
    %14 = vector.multi_reduction <add>, %13, %cst_11 [1] : vector<16x32xf32> to vector<16xf32>
    %15 = vector.shape_cast %14 : vector<16xf32> to vector<16x1xf32>
    %cst_12 = arith.constant 3.200000e+01 : f32
    %16 = vector.broadcast %cst_12 : f32 to vector<16x1xf32>
    %17 = arith.divf %15, %16 : vector<16x1xf32>
    %18 = vector.broadcast %17 : vector<16x1xf32> to vector<16x32xf32>
    %19 = arith.subf %13, %18 : vector<16x32xf32>
    %20 = arith.mulf %19, %19 : vector<16x32xf32>
    %cst_13 = arith.constant dense<0.000000e+00> : vector<16xf32>
    %21 = vector.multi_reduction <add>, %20, %cst_13 [1] : vector<16x32xf32> to vector<16xf32>
    %22 = vector.shape_cast %21 : vector<16xf32> to vector<16x1xf32>
    %cst_14 = arith.constant 3.200000e+01 : f32
    %23 = vector.broadcast %cst_14 : f32 to vector<16x1xf32>
    %24 = arith.divf %22, %23 : vector<16x1xf32>
    %cst_15 = arith.constant 9.99999974E-6 : f32
    %25 = vector.broadcast %cst_15 : f32 to vector<16x1xf32>
    %26 = arith.addf %24, %25 : vector<16x1xf32>
    %27 = math.rsqrt %26 : vector<16x1xf32>
    %28 = vector.broadcast %27 : vector<16x1xf32> to vector<16x32xf32>
    %29 = arith.mulf %19, %28 : vector<16x32xf32>
    %c0_16 = arith.constant 0 : index
    %c0_17 = arith.constant 0 : index
    %30 = vector.load %arg6[%c0_16, %c0_17] : memref<1x32xf32, #tpu.memory_space<vmem>>, vector<1x32xf32>
    %31 = vector.broadcast %30 : vector<1x32xf32> to vector<16x32xf32>
    %32 = arith.mulf %29, %31 : vector<16x32xf32>
    %c0_18 = arith.constant 0 : index
    %c0_19 = arith.constant 0 : index
    %33 = vector.load %arg7[%c0_18, %c0_19] : memref<1x32xf32, #tpu.memory_space<vmem>>, vector<1x32xf32>
    %34 = vector.broadcast %33 : vector<1x32xf32> to vector<16x32xf32>
    %35 = arith.addf %32, %34 : vector<16x32xf32>
    %c0_20 = arith.constant 0 : index
    %c0_21 = arith.constant 0 : index
    %36 = vector.load %arg8[%c0_20, %c0_21] : memref<16x32xf32, #tpu.memory_space<vmem>>, vector<16x32xf32>
    tpu.vector_store %arg8[%c0_20, %c0_21], %35 {strides = array<i32>} : memref<16x32xf32, #tpu.memory_space<vmem>>, vector<16x32xf32>,
    return
  }
  func.func @transform_0(%arg0: i32) -> (i32, i32) {
    %c0_i32 = arith.constant 0 : i32
    %c0_i32_0 = arith.constant 0 : i32
    return %arg0, %c0_i32 : i32, i32
  }
  func.func @transform_1(%arg0: i32) -> (i32, i32) {
    %c0_i32 = arith.constant 0 : i32
    %c0_i32_0 = arith.constant 0 : i32
    %c0_i32_1 = arith.constant 0 : i32
    return %c0_i32, %c0_i32_0 : i32, i32
  }
  func.func @transform_2(%arg0: i32) -> (i32, i32) {
    %c0_i32 = arith.constant 0 : i32
    %c0_i32_0 = arith.constant 0 : i32
    %c0_i32_1 = arith.constant 0 : i32
    return %c0_i32, %c0_i32_0 : i32, i32
  }
  func.func @transform_3(%arg0: i32) -> (i32, i32) {
    %c0_i32 = arith.constant 0 : i32
    %c0_i32_0 = arith.constant 0 : i32
    %c0_i32_1 = arith.constant 0 : i32
    return %c0_i32, %c0_i32_0 : i32, i32
  }
  func.func @transform_4(%arg0: i32) -> (i32, i32) {
    %c0_i32 = arith.constant 0 : i32
    %c0_i32_0 = arith.constant 0 : i32
    %c0_i32_1 = arith.constant 0 : i32
    return %c0_i32, %c0_i32_0 : i32, i32
  }
  func.func @transform_5(%arg0: i32) -> (i32, i32) {
    %c0_i32 = arith.constant 0 : i32
    %c0_i32_0 = arith.constant 0 : i32
    %c0_i32_1 = arith.constant 0 : i32
    return %c0_i32, %c0_i32_0 : i32, i32
  }
  func.func @transform_6(%arg0: i32) -> (i32, i32) {
    %c0_i32 = arith.constant 0 : i32
    %c0_i32_0 = arith.constant 0 : i32
    %c0_i32_1 = arith.constant 0 : i32
    return %c0_i32, %c0_i32_0 : i32, i32
  }
  func.func @transform_7(%arg0: i32) -> (i32, i32) {
    %c0_i32 = arith.constant 0 : i32
    %c0_i32_0 = arith.constant 0 : i32
    return %arg0, %c0_i32 : i32, i32
  }
}

</mosaic_0001>

<bundles_post_ra>
// kernel: t5_decoder_layer.5
= control target key start
LH: loop header
LB: loop body
LE: loop exit
PB: predicated region body
PF: predicated region fallthrough
CT: control target
= control target key end

     0   :  { %vm39_vm0 = vcmask 261120   ;;  %vm138_vm1 = vcmask 523264   ;;  %s439_s1 = inlined_call_operand.vmem [shape: f32[32,64], index: 1, kind: input, shape index: {}]   ;;  %s440_s0 = inlined_call_operand.vmem [shape: f32[16,32], index: 0, kind: input, shape index: {}]   ;;  %s441_s3 = inlined_call_operand.vmem [shape: f32[64,32], index: 3, kind: input, shape index: {}]   ;;  %s442_s2 = inlined_call_operand.vmem [shape: f32[1,64], index: 2, kind: input, shape index: {}]   ;;  %s443_s4 = inlined_call_operand.vmem [shape: f32[1,32], index: 4, kind: input, shape index: {}]   ;;  %s444_s5 = inlined_call_operand.vmem [shape: f32[1,32], index: 5, kind: input, shape index: {}]   ;;  %s445_s6 = inlined_call_operand.vmem [shape: f32[1,32], index: 6, kind: input, shape index: {}]   ;;  %s446_s7 = inlined_call_operand.vmem [shape: f32[16,32], index: 7, kind: output, shape index: {}]  }
   0x1   :  { %v31_v0 = vld [vmem:[%s439_s1 + $0x18] sm:$0xff]  ;;  %v30_v1 = vld [vmem:[%s439_s1 + $0x10] sm:$0xff]  ;;  %v26_v2 = vld [vmem:[%s440_s0] sm:$0xff] }
   0x2   :  { %297 = vmatprep.subr.mxu0 %v31_v0  ;;  %v29_v3 = vld [vmem:[%s439_s1 + $0x8] sm:$0xff]  ;;  %305 = vmatprep.mubr.msk.f32.mxu0 %vm39_vm0, %v26_v2  ;;  %v130_v4 = vld [vmem:[%s441_s3 + $0x38] sm:$0xff]  ;;  %v129_v5 = vld [vmem:[%s441_s3 + $0x30] sm:$0xff] }
   0x3   :  { %298 = vmatpush3.msra.mxu0 %v31_v0  ;;  %308 = vmatprep.subr.mxu1 %v130_v4  ;;  %v28_v6 = vld [vmem:[%s439_s1] sm:$0xff]  ;;  %v128_v7 = vld [vmem:[%s441_s3 + $0x28] sm:$0xff]  ;;  %v126_v10 = vld [vmem:[%s441_s3 + $0x18] sm:$0xff] }
   0x4   :  { %299 = vmatprep.subr.mxu0 %v30_v1  ;;  %309 = vmatpush3.msra.mxu1 %v130_v4  ;;  %v27_v8 = vld [vmem:[%s440_s0 + $0x8] sm:$0xff]  ;;  %v127_v9 = vld [vmem:[%s441_s3 + $0x20] sm:$0xff]  ;;  %v125_v11 = vld [vmem:[%s441_s3 + $0x10] sm:$0xff] }
   0x5   :  { %300 = vmatpush3.msra.mxu0 %v30_v1  ;;  %310 = vmatprep.subr.mxu1 %v129_v5  ;;  %v124_v12 = vld [vmem:[%s441_s3 + $0x8] sm:$0xff]  ;;  %v123_v13 = vld [vmem:[%s441_s3] sm:$0xff] }
   0x6   :  { %301 = vmatprep.subr.mxu0 %v29_v3  ;;  %311 = vmatpush3.msra.mxu1 %v129_v5  ;;  %v273_v14 = vld [vmem:[%s442_s2] ss:$0 sm:$0xff] }
   0x7   :  { %302 = vmatpush3.msra.mxu0 %v29_v3  ;;  %312 = vmatprep.subr.mxu1 %v128_v7  ;;  %v276_v22 = vld [vmem:[%s443_s4] ss:$0 sm:$0xff] }
   0x8   :  { %303 = vmatprep.subr.mxu0 %v28_v6  ;;  %313 = vmatpush3.msra.mxu1 %v128_v7  ;;  %v279_v47 = vld [vmem:[%s444_s5] ss:$0 sm:$0xff] }
   0x9   :  { %304 = vmatpush3.msra.mxu0 %v28_v6  ;;  %314 = vmatprep.subr.mxu1 %v127_v9  ;;  %v280_v49 = vld [vmem:[%s445_s6] ss:$0 sm:$0xff] }
   0xa   :  { %306 = vmatmul.mubr.msk.f32.vlgmr.msra.gmra.mxu0 %vm39_vm0, %v27_v8  ;;  %315 = vmatpush3.msra.mxu1 %v127_v9 }
   0xb   :  { %316 = vmatprep.subr.mxu1 %v126_v10 }
   0xc   :  { %317 = vmatpush3.msra.mxu1 %v126_v10 }
   0xd   :  { %318 = vmatprep.subr.mxu1 %v125_v11 }
   0xe   :  { %319 = vmatpush3.msra.mxu1 %v125_v11 }
   0xf   :  { %320 = vmatprep.subr.mxu1 %v124_v12 }
  0x10   :  { %321 = vmatpush3.msra.mxu1 %v124_v12 }
  0x11   :  { %322 = vmatprep.subr.mxu1 %v123_v13 }
  0x12   :  { %323 = vmatpush3.msra.mxu1 %v123_v13 }
  0xca   :  { %v307_v15 = vpop.f32.mrf.mxu0 }
  0xcb   :  { %v118_v16 = vadd.f32 %v307_v15, %v273_v14 }
  0xcc   :  { %v112_v17 = vpop.f32.mrf.mxu0 }
  0xcd   :  { %v113_v18 = vadd.f32 %v273_v14, %v112_v17  ;;  %v122_v20 = vmax.f32 %v118_v16, 0.0 }
  0xcf   :  { %v121_v19 = vmax.f32 %v113_v18, 0.0 }
  0xd1   :  { %324 = vmatprep.mubr.msk.f32.mxu1 %vm138_vm1, %v121_v19 }
  0xd2   :  { %325 = vmatmul.mubr.msk.f32.vlgmr.msra.gmra.mxu1 %vm138_vm1, %v122_v20 }
 0x192   :  { %v326_v21 = vpop.f32.mrf.mxu1 }
 0x193   :  { %v217_v24 = vadd.f32 %v326_v21, %v276_v22 }
 0x194   :  { %v211_v23 = vpop.f32.mrf.mxu1 }
 0x195   :  { %v212_v25 = vadd.f32 %v276_v22, %v211_v23  ;;  %v221_v28 = vadd.f32 %v217_v24, %v27_v8 }
 0x197   :  { %v220_v26 = vadd.f32 %v212_v25, %v26_v2  ;;  %v225_v29 = vsel %vm39_vm0, %v221_v28, 0.0 }
 0x199   :  { %v222_v27 = vsel %vm39_vm0, %v220_v26, 0.0 }
 0x19a   :  { %223 = vadd.xlane.f32.xlu0 %v222_v27 }
 0x19e   :  { %226 = vadd.xlane.f32.xlu0 %v225_v29 }
 0x223   :  { %v224_v30 = vpop.xlane.xlu0 %223 }
 0x224   :  { %v229_v31 = vmul.f32 0.03125, %v224_v30 }
 0x226   :  { %v231_v32 = vsub.f32 %v220_v26, %v229_v31 }
 0x227   :  { %v227_v33 = vpop.xlane.xlu0 %226 }
 0x228   :  { %v230_v34 = vmul.f32 0.03125, %v227_v33  ;;  %v233_v35 = vmul.f32 %v231_v32, %v231_v32 }
 0x22a   :  { %v232_v36 = vsub.f32 %v221_v28, %v230_v34  ;;  %v235_v37 = vsel %vm39_vm0, %v233_v35, 0.0 }
 0x22b   :  { %236 = vadd.xlane.f32.xlu1 %v235_v37 }
 0x22c   :  { %v234_v38 = vmul.f32 %v232_v36, %v232_v36 }
 0x22e   :  { %v238_v39 = vsel %vm39_vm0, %v234_v38, 0.0 }
 0x22f   :  { %239 = vadd.xlane.f32.xlu1 %v238_v39 }
 0x2b4   :  { %v237_v40 = vpop.xlane.xlu1 %236 }
 0x2b5   :  { %v241_v41 = vmul.f32 0.03125, %v237_v40 }
 0x2b7   :  { %v243_v42 = vadd.f32 1e-05, %v241_v41 }
 0x2b8   :  { %v240_v43 = vpop.xlane.xlu1 %239 }
 0x2b9   :  { %327 = vrsqrt.f32 %v243_v42  ;;  %v242_v44 = vmul.f32 0.03125, %v240_v43 }
 0x2bb   :  { %v244_v45 = vadd.f32 1e-05, %v242_v44 }
 0x2bd   :  { %329 = vrsqrt.f32 %v244_v45 }
 0x2c6   :  { %v328_v46 = vpop.eup %327 }
 0x2c7   :  { %v247_v48 = vmul.f32 %v328_v46, %v231_v32 }
 0x2c9   :  { %v256_v50 = vmul.f32 %v279_v47, %v247_v48 }
 0x2ca   :  { %v330_v51 = vpop.eup %329 }
 0x2cb   :  { %v265_v52 = vadd.f32 %v280_v49, %v256_v50  ;;  %v248_v53 = vmul.f32 %v330_v51, %v232_v36 }
 0x2cd   :  { %267 = vst.msk [vmem:[%s446_s7] sm:$0xff] %vm39_vm0, %v265_v52  ;;  %v257_v54 = vmul.f32 %v279_v47, %v248_v53 }
 0x2cf   :  { %v266_v55 = vadd.f32 %v280_v49, %v257_v54 }
 0x2d1   :  { %268 = vst.msk [vmem:[%s446_s7 + $0x8] sm:$0xff] %vm39_vm0, %v266_v55 }

// kernel: t5_decoder_layer.4
= control target key start
LH: loop header
LB: loop body
LE: loop exit
PB: predicated region body
PF: predicated region fallthrough
CT: control target
= control target key end

     0   :  { %s1778_s17 = smov 0   ;;  %s1987_s0 = inlined_call_operand.vmem [shape: f32[2,8,32], index: 0, kind: input, shape index: {}]   ;;  %s1988_s1 = inlined_call_operand.vmem [shape: f32[2,12,32], index: 1, kind: input, shape index: {}]   ;;  %s1989_s2 = inlined_call_operand.vmem [shape: f32[32,32], index: 2, kind: input, shape index: {}]   ;;  %s1990_s3 = inlined_call_operand.vmem [shape: f32[1,32], index: 3, kind: input, shape index: {}]   ;;  %s1991_s4 = inlined_call_operand.vmem [shape: f32[32,64], index: 4, kind: input, shape index: {}]   ;;  %s1992_s5 = inlined_call_operand.vmem [shape: f32[1,64], index: 5, kind: input, shape index: {}]   ;;  %s1993_s6 = inlined_call_operand.vmem [shape: f32[32,32], index: 6, kind: input, shape index: {}]   ;;  %s1994_s7 = inlined_call_operand.vmem [shape: f32[1,32], index: 7, kind: input, shape index: {}]   ;;  %s1995_s8 = inlined_call_operand.vmem [shape: f32[4,8,12], index: 8, kind: input, shape index: {}]   ;;  %s1996_s9 = inlined_call_operand.vmem [shape: f32[1,32], index: 9, kind: input, shape index: {}]   ;;  %s1997_s10 = inlined_call_operand.vmem [shape: f32[1,32], index: 10, kind: input, shape index: {}]   ;;  %s1998_s11 = inlined_call_operand.vmem [shape: f32[2,8,32], index: 11, kind: output, shape index: {}]  }
   0x1 LB: > { %s1487_s18 = sadd.s32 4294967295, %s1704_s17   ;;  %p1491_p0 = scmp.ge.s32.totalorder %s1704_s17, 1  ;;  %s1704_s17 = sphi %s1778_s17, %s21_s17  }
   0x2   : > { %p346_p1 = scmp.lt.s32.totalorder %s1704_s17, 3 }
   0x4   : > { %p347_p2 = pnand %p1491_p0, %p346_p1 }
   0x5   : > { %p389_p3 = scmp.lt.s32.totalorder (!%p347_p2), %s1487_s18, 1  ;;  %s1708_s28 = smov (!%p347_p2), 96  }
   0x6   : > { %350 = sbr.rel (%p347_p2) target bundleno = 2584 (0xa18), region = 64  ;;  %s1709_s12 = smov (!%p347_p2), 120  }
   0x7   : > { %s1710_s13 = smov (!%p347_p2), 112   ;;  %s1711_s21 = smov (!%p347_p2), 88  }
   0x8   : > { %s1712_s24 = smov (!%p347_p2), 80   ;;  %s1713_s25 = smov (!%p347_p2), 104  }
   0x9   : > { %s1715_s29 = smov (!%p347_p2), 8   ;;  %s1716_s30 = smov (!%p347_p2), 16  }
   0xb   : > { %v493_v0 = vld [vmem:[%s1991_s4 + $0x18] sm:$0xff]  ;;  %v492_v1 = vld [vmem:[%s1991_s4 + $0x10] sm:$0xff]  ;;  %v1706_v2 = vmov 0.0   ;;  %v491_v5 = vld [vmem:[%s1991_s4 + $0x8] sm:$0xff]  ;;  %s2000_s18 = smov (!%p389_p3, %s1487_s18), 1  ;;  %vm416_vm0 = vcmask 261120  }
   0xc   : > { %1582 = vmatprep.subr.mxu1 %v493_v0  ;;  %1571 = vmatprep.subr.mxu0 %v1706_v2  ;;  %v408_v3 = vld [vmem:[%s1989_s2 + $0x18] sm:$0xff]  ;;  %v407_v4 = vld [vmem:[%s1989_s2 + $0x10] sm:$0xff]  ;;  %v406_v6 = vld [vmem:[%s1989_s2 + $0x8] sm:$0xff]  ;;  %s1530_s14 = sshll.u32 %s2000_s18, 4  ;;  %s1492_s15 = sshll.u32 %s2000_s18, 3  ;;  %vm1707_vm1 = vmmov 0  }
   0xd   : > { %1583 = vmatpush3.msra.mxu1 %v493_v0  ;;  %1572 = vmatpush3.msra.mxu0 %v408_v3  ;;  %v490_v7 = vld [vmem:[%s1991_s4] sm:$0xff]  ;;  %s397_s20 = scalar_lea.vmem %s1988_s1, %s1530_s14  ;;  %s392_s23 = scalar_lea.vmem %s1987_s0, %s1492_s15  ;;  %vm582_vm2 = vcmask 64512   ;;  %vm685_vm3 = vcmask 1043456   ;;  %vm665_vm4 = vcmask 97280   ;;  %v1515_v42 = vld [vmem:[%s1995_s8 + $0x10] sm:$0xff]  ;;  %v1509_v56 = vld [vmem:[%s1995_s8 + $0x8] sm:$0xff] }
   0xe   : > { %1584 = vmatprep.subr.mxu1 %v492_v1  ;;  %1573 = vmatprep.subr.mxu0 %v1706_v2  ;;  %v403_v8 = vld [vmem:[%s397_s20] sm:$0xff]  ;;  %v404_v9 = vld [vmem:[%s397_s20 + $0x8] sm:$0xf]  ;;  %vm1302_vm5 = vcmask 130048   ;;  %vm1304_vm6 = vcmask 195584  }
   0xf   : > { %1585 = vmatpush3.msra.mxu1 %v492_v1  ;;  %1574 = vmatpush3.msra.mxu0 %v407_v4  ;;  %v405_v10 = vld [vmem:[%s1989_s2] sm:$0xff] }
  0x10   : > { %1586 = vmatprep.subr.mxu1 %v491_v5  ;;  %1575 = vmatprep.subr.mxu0 %v1706_v2  ;;  %v1827_v11 = vld [vmem:[%s392_s23] sm:$0xff]  ;;  %s1717_s23 = smov 24  }
  0x11   : > { %1587 = vmatpush3.msra.mxu1 %v491_v5  ;;  %1576 = vmatpush3.msra.mxu0 %v406_v6  ;;  %v1498_v12 = vld [vmem:[%s1992_s5] ss:$0 sm:$0xff] }
  0x12   : > { %1588 = vmatprep.subr.mxu1 %v490_v7  ;;  %1590 = vmatprep.mubr.msk.f32.mxu1 %vm416_vm0, %v403_v8  ;;  %v1496_v17 = vld [vmem:[%s1990_s3] ss:$0 sm:$0xff] }
  0x13   : > { %1589 = vmatpush3.msra.mxu1 %v490_v7  ;;  %1577 = vmatprep.subr.mxu0 %v1706_v2  ;;  %v663_v29 = vld [vmem:[%s1995_s8] sm:$0xff] }
  0x14   : > { %1591 = vmatmul.mubr.msk.f32.vlgmr.msra.gmra.mxu1 %vm416_vm0, %v404_v9  ;;  %1578 = vmatpush3.msra.mxu0 %v405_v10 }
  0x15   : > { %1579 = vmatprep.mubr.msk.f32.mxu0 %vm1707_vm1, %v1706_v2  ;;  %1593 = vmatprep.subr.mxu0 %v1706_v2 }
  0x16   : > { %1580 = vmatmul.mubr.msk.f32.vlgmr.msra.gmra.mxu0 %vm416_vm0, %v1827_v11  ;;  %1600 = vmatprep.subr.mxu1 %v1706_v2 }
  0x17   : > { %1597 = vmatprep.mubr.msk.f32.mxu0 %vm1707_vm1, %v1706_v2  ;;  %1604 = vmatprep.mubr.msk.f32.mxu1 %vm1707_vm1, %v1706_v2 }
  0xd4   : > { %v1592_v13 = vpop.f32.mrf.mxu1 }
  0xd5   : > { %v1843_v14 = vadd.f32 %v1592_v13, %v1498_v12 }
  0xd6   : > { %v573_v15 = vpop.f32.mrf.mxu1  ;;  %v486_v16 = vpop.f32.mrf.mxu0 }
  0xd7   : > { %679 = vrot.lane.b32.xlu1 %v1843_v14, %s1708_s28  ;;  %1594 = vmatpush3.xpose.msk.msra.mxu0 %vm582_vm2, %v1843_v14  ;;  %v1852_v19 = vadd.f32 %v1498_v12, %v573_v15  ;;  %v1854_v20 = vadd.f32 %v1496_v17, %v486_v16 }
  0xd8   : > { %1595 = vmatprep.subr.mxu0 %v1706_v2  ;;  %v1581_v18 = vpop.f32.mrf.mxu0 }
  0xdb   : > { %677 = vrot.lane.b32.xlu1 %v1852_v19, %s1708_s28  ;;  %1596 = vmatpush3.xpose.msk.msra.mxu0 %vm582_vm2, %v1852_v19  ;;  %s1714_s28 = smov 72  }
  0xdc   : > { %1621 = vmatprep.subr.mxu0 %v1706_v2 }
  0xde   : > { %1598 = vmatmul.mubr.msk.f32.vlgmr.msra.gmra.mxu0 %vm582_vm2, %v1854_v20 }
  0xdf   : > { %760 = vrot.lane.b32.xlu1 %v1852_v19, %s1709_s12  ;;  %1625 = vmatprep.mubr.msk.f32.mxu0 %vm1707_vm1, %v1706_v2 }
  0xe3   : > { %939 = vrot.lane.b32.xlu1 %v1843_v14, %s1710_s13 }
  0xe7   : > { %758 = vrot.lane.b32.xlu1 %v1854_v20, %s1709_s12 }
  0xeb   : > { %937 = vrot.lane.b32.xlu1 %v1852_v19, %s1710_s13 }
  0xef   : > { %935 = vrot.lane.b32.xlu1 %v1854_v20, %s1710_s13  ;;  %s401_s13 = scalar_lea.vmem %s1998_s11, %s1492_s15 }
 0x149   : > { %v680_v21 = vpop.permute.xlu1 %679 }
 0x14a   : > { %1601 = vmatpush3.msk.msra.mxu1 %vm685_vm3, %v680_v21 }
 0x14b   : > { %1602 = vmatprep.subr.mxu1 %v1706_v2 }
 0x14d   : > { %v678_v22 = vpop.permute.xlu1 %677 }
 0x14e   : > { %1603 = vmatpush3.msra.mxu1 %v678_v22 }
 0x14f   : > { %1607 = vmatprep.subr.mxu1 %v1706_v2 }
 0x151   : > { %v761_v23 = vpop.permute.xlu1 %760 }
 0x155   : > { %v940_v24 = vpop.permute.xlu1 %939 }
 0x156   : > { %1622 = vmatpush3.xpose.msk.msra.mxu0 %vm582_vm2, %v940_v24 }
 0x157   : > { %1623 = vmatprep.subr.mxu0 %v1706_v2 }
 0x159   : > { %v759_v25 = vpop.permute.xlu1 %758 }
 0x15d   : > { %v938_v26 = vpop.permute.xlu1 %937 }
 0x15e   : > { %1624 = vmatpush3.xpose.msk.msra.mxu0 %vm582_vm2, %v938_v26 }
 0x15f   : > { %1642 = vmatprep.subr.mxu0 %v1706_v2 }
 0x161   : > { %v936_v27 = vpop.permute.xlu1 %935 }
 0x162   : > { %1626 = vmatmul.mubr.msk.f32.vlgmr.msra.gmra.mxu0 %vm582_vm2, %v936_v27 }
 0x163   : > { %1646 = vmatprep.mubr.msk.f32.mxu0 %vm1707_vm1, %v1706_v2 }
 0x19e   : > { %v658_v28 = vpop.f32.mrf.mxu0 }
 0x19f   : > { %v662_v30 = vmul.f32 0.35355338, %v658_v28 }
 0x1a0   : > { %v1599_v31 = vpop.f32.mrf.mxu0 }
 0x1a1   : > { %v664_v32 = vadd.f32 %v663_v29, %v662_v30 }
 0x1a3   : > { %v666_v33 = vsel %vm665_vm4, %v664_v32, -inf }
 0x1a4   : > { %667 = vmax.xlane.f32.xlu0 %v666_v33 }
 0x222   : > { %v1013_v34 = vpop.f32.mrf.mxu0 }
 0x223   : > { %v1017_v41 = vmul.f32 0.35355338, %v1013_v34 }
 0x224   : > { %v1627_v35 = vpop.f32.mrf.mxu0 }
 0x225   : > { %v1020_v43 = vadd.f32 %v1515_v42, %v1017_v41  ;;  %v1306_v41 = vld [vmem:[%s1993_s6] sm:$0xff] }
 0x227   : > { %v1021_v44 = vsel %vm665_vm4, %v1020_v43, -inf }
 0x22d   : > { %v668_v36 = vpop.xlane.xlu0 %667 }
 0x22e   : > { %v669_v37 = vsub.f32 %v664_v32, %v668_v36 }
 0x230   : > { %v670_v38 = vmul.f32 1.442695, %v669_v37 }
 0x232   : > { %1680 = vpow2.f32 %v670_v38 }
 0x23f   : > { %v1681_v39 = vpop.eup %1680 }
 0x240   : > { %v672_v40 = vsel %vm665_vm4, %v1681_v39, 0.0 }
 0x241   : > { %673 = vadd.xlane.f32.xlu0 %v672_v40  ;;  %v1307_v40 = vld [vmem:[%s1993_s6 + $0x8] sm:$0xff] }
 0x257   : > { %762 = vrot.lane.b32.xlu0 %v1843_v14, %s1709_s12 }
 0x276   : > { %1022 = vmax.xlane.f32.xlu0 %v1021_v44 }
 0x28c   : > { %857 = vrot.lane.b32.xlu0 %v1843_v14, %s1711_s21 }
 0x2ca   : > { %v674_v45 = vpop.xlane.xlu0 %673 }
 0x2cb   : > { %1682 = vrcp.f32 %v674_v45 }
 0x2ce   : > { %v763_v48 = vpop.permute.xlu0 %762 }
 0x2d8   : > { %v1683_v46 = vpop.eup %1682 }
 0x2d9   : > { %v676_v47 = vmul.f32 %v1683_v46, %v1681_v39  ;;  %v1309_v39 = vld [vmem:[%s1993_s6 + $0x18] sm:$0xff] }
 0x2db   : > { %1605 = vmatmul.mubr.msk.f32.vlgmr.msra.gmra.mxu1 %vm665_vm4, %v676_v47 }
 0x2dc   : > { %1608 = vmatpush3.xpose.msk.msra.mxu1 %vm582_vm2, %v763_v48  ;;  %1611 = vmatprep.mubr.msk.f32.mxu1 %vm1707_vm1, %v1706_v2 }
 0x2dd   : > { %1609 = vmatprep.subr.mxu1 %v1706_v2 }
 0x2e0   : > { %1610 = vmatpush3.xpose.msk.msra.mxu1 %vm582_vm2, %v761_v23 }
 0x2e1   : > { %1614 = vmatprep.subr.mxu1 %v1706_v2 }
 0x2e3   : > { %1612 = vmatmul.mubr.msk.f32.vlgmr.msra.gmra.mxu1 %vm582_vm2, %v759_v25  ;;  %v1521_v25 = vld [vmem:[%s1995_s8 + $0x18] sm:$0xff] }
 0x2e4   : > { %1618 = vmatprep.mubr.msk.f32.mxu1 %vm1707_vm1, %v1706_v2 }
 0x2ff   : > { %v1023_v49 = vpop.xlane.xlu0 %1022 }
 0x300   : > { %v1024_v51 = vsub.f32 %v1020_v43, %v1023_v49 }
 0x302   : > { %v1025_v52 = vmul.f32 1.442695, %v1024_v51 }
 0x303   : > { %v858_v50 = vpop.permute.xlu0 %857 }
 0x304   : > { %1615 = vmatpush3.msk.msra.mxu1 %vm685_vm3, %v858_v50  ;;  %1684 = vpow2.f32 %v1025_v52 }
 0x305   : > { %1616 = vmatprep.subr.mxu1 %v1706_v2 }
 0x311   : > { %v1685_v61 = vpop.eup %1684 }
 0x312   : > { %v1027_v62 = vsel %vm665_vm4, %v1685_v61, 0.0 }
 0x39b   : > { %v1906_v53 = vpop.f32.mrf.mxu1 }
 0x39d   : > { %v1606_v54 = vpop.f32.mrf.mxu1 }
 0x3a3   : > { %v836_v55 = vpop.f32.mrf.mxu1 }
 0x3a4   : > { %v840_v57 = vmul.f32 0.35355338, %v836_v55 }
 0x3a5   : > { %v1613_v58 = vpop.f32.mrf.mxu1 }
 0x3a6   : > { %v843_v59 = vadd.f32 %v1509_v56, %v840_v57 }
 0x3a8   : > { %v844_v60 = vsel %vm665_vm4, %v843_v59, -inf }
 0x3a9   : > { %845 = vmax.xlane.f32.xlu1 %v844_v60 }
 0x3ad   : > { %1028 = vadd.xlane.f32.xlu1 %v1027_v62 }
 0x3be   : > { %855 = vrot.lane.b32.xlu1 %v1852_v19, %s1711_s21 }
 0x3c2   : > { %1034 = vrot.lane.b32.xlu1 %v1843_v14, %s1712_s24 }
 0x3c6   : > { %1116 = vrot.lane.b32.xlu1 %v1843_v14, %s1713_s25 }
 0x3ca   : > { %1112 = vrot.lane.b32.xlu1 %v1854_v20, %s1713_s25 }
 0x432   : > { %v846_v63 = vpop.xlane.xlu1 %845 }
 0x433   : > { %v847_v0 = vsub.f32 %v843_v59, %v846_v63 }
 0x435   : > { %v848_v1 = vmul.f32 1.442695, %v847_v0 }
 0x436   : > { %v1029_v3 = vpop.xlane.xlu1 %1028 }
 0x437   : > { %1686 = vpow2.f32 %v848_v1  ;;  %v1527_v1 = vld [vmem:[%s1997_s10] ss:$0 sm:$0xff] }
 0x43a   : > { %v856_v4 = vpop.permute.xlu1 %855 }
 0x43b   : > { %1617 = vmatpush3.msra.mxu1 %v856_v4 }
 0x43c   : > { %1628 = vmatprep.subr.mxu1 %v1706_v2 }
 0x43e   : > { %v1035_v9 = vpop.permute.xlu1 %1034 }
 0x442   : > { %v1117_v16 = vpop.permute.xlu1 %1116 }
 0x444   : > { %v1687_v5 = vpop.eup %1686 }
 0x445   : > { %v850_v6 = vsel %vm665_vm4, %v1687_v5, 0.0 }
 0x446   : > { %851 = vadd.xlane.f32.xlu0 %v850_v6  ;;  %v1113_v18 = vpop.permute.xlu1 %1112 }
 0x45c   : > { %1032 = vrot.lane.b32.xlu0 %v1852_v19, %s1712_s24 }
 0x460   : > { %1114 = vrot.lane.b32.xlu0 %v1852_v19, %s1713_s25 }
 0x4cf   : > { %v852_v7 = vpop.xlane.xlu0 %851 }
 0x4d0   : > { %1688 = vrcp.f32 %v852_v7 }
 0x4d1   : > { %1690 = vrcp.f32 %v1029_v3 }
 0x4d3   : > { %v1033_v13 = vpop.permute.xlu0 %1032 }
 0x4d7   : > { %v1115_v17 = vpop.permute.xlu0 %1114 }
 0x4dd   : > { %v1689_v8 = vpop.eup %1688 }
 0x4de   : > { %v854_v10 = vmul.f32 %v1689_v8, %v1687_v5  ;;  %v1691_v12 = vpop.eup %1690 }
 0x4df   : > { %v1031_v15 = vmul.f32 %v1691_v12, %v1685_v61 }
 0x4e0   : > { %1619 = vmatmul.mubr.msk.f32.vlgmr.msra.gmra.mxu1 %vm665_vm4, %v854_v10 }
 0x4e1   : > { %1629 = vmatpush3.msk.msra.mxu1 %vm685_vm3, %v1035_v9  ;;  %1632 = vmatprep.mubr.msk.f32.mxu1 %vm1707_vm1, %v1706_v2 }
 0x4e2   : > { %1630 = vmatprep.subr.mxu1 %v1706_v2 }
 0x4e3   : > { %1631 = vmatpush3.msra.mxu1 %v1033_v13 }
 0x4e4   : > { %1635 = vmatprep.subr.mxu1 %v1706_v2  ;;  %1633 = vmatmul.mubr.msk.f32.vlgmr.msra.gmra.mxu1 %vm665_vm4, %v1031_v15 }
 0x4e5   : > { %1636 = vmatpush3.xpose.msk.msra.mxu1 %vm582_vm2, %v1117_v16  ;;  %1639 = vmatprep.mubr.msk.f32.mxu1 %vm1707_vm1, %v1706_v2 }
 0x4e6   : > { %1637 = vmatprep.subr.mxu1 %v1706_v2 }
 0x4e9   : > { %1638 = vmatpush3.xpose.msk.msra.mxu1 %vm582_vm2, %v1115_v17 }
 0x4ec   : > { %1640 = vmatmul.mubr.msk.f32.vlgmr.msra.gmra.mxu1 %vm582_vm2, %v1113_v18 }
 0x5a0   : > { %v931_v20 = vpop.f32.mrf.mxu1 }
 0x5a2   : > { %v1620_v21 = vpop.f32.mrf.mxu1 }
 0x5a4   : > { %v1108_v22 = vpop.f32.mrf.mxu1 }
 0x5a6   : > { %v1634_v23 = vpop.f32.mrf.mxu1 }
 0x5ac   : > { %v1190_v24 = vpop.f32.mrf.mxu1 }
 0x5ad   : > { %v1194_v26 = vmul.f32 0.35355338, %v1190_v24 }
 0x5ae   : > { %v1641_v27 = vpop.f32.mrf.mxu1 }
 0x5af   : > { %v1197_v28 = vadd.f32 %v1521_v25, %v1194_v26 }
 0x5b1   : > { %v1198_v29 = vsel %vm665_vm4, %v1197_v28, -inf }
 0x5b2   : > { %1199 = vmax.xlane.f32.xlu0 %v1198_v29 }
 0x5c8   : > { %1211 = vrot.lane.b32.xlu0 %v1843_v14, %s1714_s28 }
 0x5cc   : > { %1290 = vrot.lane.b32.xlu0 %v931_v20, %s1715_s29 }
 0x63b   : > { %v1200_v30 = vpop.xlane.xlu0 %1199 }
 0x63c   : > { %v1201_v31 = vsub.f32 %v1197_v28, %v1200_v30 }
 0x63e   : > { %v1202_v32 = vmul.f32 1.442695, %v1201_v31 }
 0x63f   : > { %v1212_v33 = vpop.permute.xlu0 %1211 }
 0x640   : > { %1692 = vpow2.f32 %v1202_v32  ;;  %1643 = vmatpush3.msk.msra.mxu0 %vm685_vm3, %v1212_v33 }
 0x641   : > { %1644 = vmatprep.subr.mxu0 %v1706_v2 }
 0x643   : > { %v1291_v44 = vpop.permute.xlu0 %1290 }
 0x644   : > { %v1301_v46 = vsel %vm582_vm2, %v1906_v53, %v1291_v44 }
 0x64d   : > { %v1693_v34 = vpop.eup %1692 }
 0x64e   : > { %v1204_v35 = vsel %vm665_vm4, %v1693_v34, 0.0 }
 0x64f   : > { %1205 = vadd.xlane.f32.xlu1 %v1204_v35 }
 0x660   : > { %1209 = vrot.lane.b32.xlu1 %v1852_v19, %s1714_s28  ;;  %v1308_v19 = vld [vmem:[%s1993_s6 + $0x10] sm:$0xff] }
 0x664   : > { %1294 = vrot.lane.b32.xlu1 %v1108_v22, %s1716_s30 }
 0x6d8   : > { %v1206_v14 = vpop.xlane.xlu1 %1205 }
 0x6d9   : > { %1694 = vrcp.f32 %v1206_v14 }
 0x6dc   : > { %v1210_v36 = vpop.permute.xlu1 %1209 }
 0x6dd   : > { %1645 = vmatpush3.msra.mxu0 %v1210_v36 }
 0x6de   : > { %1649 = vmatprep.subr.mxu0 %v1706_v2 }
 0x6e0   : > { %v1295_v45 = vpop.permute.xlu1 %1294 }
 0x6e1   : > { %v1303_v47 = vsel %vm1302_vm5, %v1301_v46, %v1295_v45 }
 0x6e6   : > { %v1695_v37 = vpop.eup %1694 }
 0x6e7   : > { %v1208_v38 = vmul.f32 %v1695_v37, %v1693_v34 }
 0x6e9   : > { %1647 = vmatmul.mubr.msk.f32.vlgmr.msra.gmra.mxu0 %vm665_vm4, %v1208_v38 }
 0x6ea   : > { %1657 = vmatprep.mubr.msk.f32.mxu0 %vm1707_vm1, %v1706_v2  ;;  %1650 = vmatpush3.msra.mxu0 %v1309_v39 }
 0x6eb   : > { %1651 = vmatprep.subr.mxu0 %v1706_v2 }
 0x6ec   : > { %1652 = vmatpush3.msra.mxu0 %v1308_v19 }
 0x6ed   : > { %1653 = vmatprep.subr.mxu0 %v1706_v2 }
 0x6ee   : > { %1654 = vmatpush3.msra.mxu0 %v1307_v40 }
 0x6ef   : > { %1655 = vmatprep.subr.mxu0 %v1706_v2  ;;  %v1524_v2 = vld [vmem:[%s1994_s7] ss:$0 sm:$0xff] }
 0x6f0   : > { %1656 = vmatpush3.msra.mxu0 %v1306_v41 }
 0x7a9   : > { %v1285_v42 = vpop.f32.mrf.mxu0 }
 0x7aa   : > { %1298 = vrot.lane.b32.xlu0 %v1285_v42, %s1717_s23 }
 0x7ab   : > { %v1648_v43 = vpop.f32.mrf.mxu0 }
 0x81c   : > { %v1299_v48 = vpop.permute.xlu0 %1298 }
 0x81d   : > { %v1305_v49 = vsel %vm1304_vm6, %v1303_v47, %v1299_v48 }
 0x81e   : > { %1658 = vmatmul.mubr.msk.f32.vlgmr.msra.gmra.mxu0 %vm416_vm0, %v1305_v49 }
 0x8de   : > { %v1386_v50 = vpop.f32.mrf.mxu0 }
 0x8df   : > { %v1387_v51 = vadd.f32 %v1524_v2, %v1386_v50 }
 0x8e0   : > { %v1659_v52 = vpop.f32.mrf.mxu0 }
 0x8e1   : > { %v1390_v54 = vadd.f32 %v1387_v51, %v1827_v11  ;;  %v1526_v11 = vld [vmem:[%s1996_s9] ss:$0 sm:$0xff] }
 0x8e3   : > { %v1391_v55 = vsel %vm416_vm0, %v1390_v54, 0.0 }
 0x8e4   : > { %1392 = vadd.xlane.f32.xlu1 %v1391_v55 }
 0x96d   : > { %v1393_v56 = vpop.xlane.xlu1 %1392 }
 0x96e   : > { %v1395_v53 = vmul.f32 0.03125, %v1393_v56 }
 0x970   : > { %v1396_v57 = vsub.f32 %v1390_v54, %v1395_v53 }
 0x972   : > { %v1397_v58 = vmul.f32 %v1396_v57, %v1396_v57 }
 0x974   : > { %v1398_v59 = vsel %vm416_vm0, %v1397_v58, 0.0 }
 0x975   : > { %1399 = vadd.xlane.f32.xlu0 %v1398_v59 }
 0x9fe   : > { %v1400_v60 = vpop.xlane.xlu0 %1399 }
 0x9ff   : > { %v1401_v61 = vmul.f32 0.03125, %v1400_v60 }
 0xa01   : > { %v1402_v62 = vadd.f32 1e-05, %v1401_v61 }
 0xa03   : > { %1696 = vrsqrt.f32 %v1402_v62 }
 0xa10   : > { %v1697_v63 = vpop.eup %1696 }
 0xa11   : > { %v1404_v0 = vmul.f32 %v1697_v63, %v1396_v57 }
 0xa13   : > { %v1412_v3 = vmul.f32 %v1526_v11, %v1404_v0 }
 0xa15   : > { %v1420_v4 = vadd.f32 %v1527_v1, %v1412_v3 }
 0xa17   : > { %1421 = vst.msk [vmem:[%s401_s13] sm:$0xff] %vm416_vm0, %v1420_v4 }
 0xa18 PF: > { %s21_s17 = sadd.s32 1, %s1704_s17  }
 0xa19   : > { %p18_p4 = scmp.ge.s32.totalorder %s21_s17, 4  }
 0xa1b   :  { %20 = sbr.rel (!%p18_p4) target bundleno = 1 (0x1), region = 100 }

// kernel: t5_decoder_layer.3
= control target key start
LH: loop header
LB: loop body
LE: loop exit
PB: predicated region body
PF: predicated region fallthrough
CT: control target
= control target key end

     0   :  { %s1697_s17 = smov 0   ;;  %s1868_s0 = inlined_call_operand.vmem [shape: f32[2,8,32], index: 0, kind: input, shape index: {}, may-alias: {0,1}]   ;;  %s1869_s1 = inlined_call_operand.vmem [shape: f32[2,8,32], index: 1, kind: input, shape index: {}, may-alias: {0,1}]   ;;  %s1870_s2 = inlined_call_operand.vmem [shape: f32[32,32], index: 2, kind: input, shape index: {}]   ;;  %s1871_s3 = inlined_call_operand.vmem [shape: f32[1,32], index: 3, kind: input, shape index: {}]   ;;  %s1872_s4 = inlined_call_operand.vmem [shape: f32[32,64], index: 4, kind: input, shape index: {}]   ;;  %s1873_s5 = inlined_call_operand.vmem [shape: f32[1,64], index: 5, kind: input, shape index: {}]   ;;  %s1874_s6 = inlined_call_operand.vmem [shape: f32[32,32], index: 6, kind: input, shape index: {}]   ;;  %s1875_s7 = inlined_call_operand.vmem [shape: f32[1,32], index: 7, kind: input, shape index: {}]   ;;  %s1876_s8 = inlined_call_operand.vmem [shape: f32[4,8,8], index: 8, kind: input, shape index: {}]   ;;  %s1877_s9 = inlined_call_operand.vmem [shape: f32[1,32], index: 9, kind: input, shape index: {}]   ;;  %s1878_s10 = inlined_call_operand.vmem [shape: f32[1,32], index: 10, kind: input, shape index: {}]   ;;  %s1879_s11 = inlined_call_operand.vmem [shape: f32[2,8,32], index: 11, kind: output, shape index: {}]  }
   0x1 LB: > { %s1442_s18 = sadd.s32 4294967295, %s1623_s17   ;;  %p1446_p0 = scmp.ge.s32.totalorder %s1623_s17, 1  ;;  %s1623_s17 = sphi %s1697_s17, %s21_s17  }
   0x2   : > { %p345_p1 = scmp.lt.s32.totalorder %s1623_s17, 3 }
   0x4   : > { %p346_p2 = pnand %p1446_p0, %p345_p1 }
   0x5   : > { %p387_p3 = scmp.lt.s32.totalorder (!%p346_p2), %s1442_s18, 1  ;;  %s1627_s28 = smov (!%p346_p2), 112  }
   0x6   : > { %349 = sbr.rel (%p346_p2) target bundleno = 1667 (0x683), region = 64  ;;  %s1628_s29 = smov (!%p346_p2), 120  }
   0x7   : > { %s1629_s30 = smov (!%p346_p2), 104   ;;  %s1630_s22 = smov (!%p346_p2), 96  }
   0x8   : > { %s1632_s24 = smov (!%p346_p2), 72   ;;  %s1633_s25 = smov (!%p346_p2), 88  }
   0x9   : > { %s1634_s16 = smov (!%p346_p2), 8  }
   0xb   : > { %v489_v0 = vld [vmem:[%s1872_s4 + $0x18] sm:$0xff]  ;;  %v1625_v2 = vmov 0.0   ;;  %v488_v3 = vld [vmem:[%s1872_s4 + $0x10] sm:$0xff]  ;;  %s1881_s18 = smov (!%p387_p3, %s1442_s18), 1  ;;  %v487_v5 = vld [vmem:[%s1872_s4 + $0x8] sm:$0xff]  ;;  %vm412_vm0 = vcmask 261120  }
   0xc   : > { %v404_v1 = vld [vmem:[%s1870_s2 + $0x18] sm:$0xff]  ;;  %1517 = vmatprep.subr.mxu1 %v1625_v2  ;;  %1506 = vmatprep.subr.mxu0 %v1625_v2  ;;  %v403_v4 = vld [vmem:[%s1870_s2 + $0x10] sm:$0xff]  ;;  %v402_v6 = vld [vmem:[%s1870_s2 + $0x8] sm:$0xff]  ;;  %s1727_s12 = sshll.u32 %s1881_s18, 3  ;;  %vm1626_vm1 = vmmov 0   ;;  %vm570_vm2 = vcmask 64512  }
   0xd   : > { %1518 = vmatpush3.msra.mxu1 %v489_v0  ;;  %1507 = vmatpush3.msra.mxu0 %v404_v1  ;;  %v486_v7 = vld [vmem:[%s1872_s4] sm:$0xff]  ;;  %s394_s19 = scalar_lea.vmem %s1869_s1, %s1727_s12  ;;  %s390_s23 = scalar_lea.vmem %s1868_s0, %s1727_s12  ;;  %v1459_v32 = vld [vmem:[%s1876_s8 + $0x8] sm:$0xff]  ;;  %v1463_v37 = vld [vmem:[%s1876_s8 + $0x10] sm:$0xff]  ;;  %vm1257_vm3 = vcmask 130048   ;;  %vm1259_vm4 = vcmask 195584  }
   0xe   : > { %1519 = vmatprep.subr.mxu1 %v1625_v2  ;;  %1508 = vmatprep.subr.mxu0 %v1625_v2  ;;  %v400_v8 = vld [vmem:[%s394_s19] sm:$0xff]  ;;  %v1467_v43 = vld [vmem:[%s1876_s8 + $0x18] sm:$0xff]  ;;  %s1635_s19 = smov 16   ;;  %s1636_s18 = smov 24  }
   0xf   : > { %1520 = vmatpush3.msra.mxu1 %v488_v3  ;;  %1509 = vmatpush3.msra.mxu0 %v403_v4  ;;  %v401_v9 = vld [vmem:[%s1870_s2] sm:$0xff] }
  0x10   : > { %1521 = vmatprep.subr.mxu1 %v1625_v2  ;;  %1510 = vmatprep.subr.mxu0 %v1625_v2  ;;  %v1749_v10 = vld [vmem:[%s390_s23] sm:$0xff]  ;;  %s1631_s23 = smov 80  }
  0x11   : > { %1522 = vmatpush3.msra.mxu1 %v487_v5  ;;  %1511 = vmatpush3.msra.mxu0 %v402_v6  ;;  %v1452_v11 = vld [vmem:[%s1873_s5] ss:$0 sm:$0xff] }
  0x12   : > { %1523 = vmatprep.subr.mxu1 %v1625_v2  ;;  %1525 = vmatprep.mubr.msk.f32.mxu1 %vm1626_vm1, %v1625_v2  ;;  %v1450_v13 = vld [vmem:[%s1871_s3] ss:$0 sm:$0xff] }
  0x13   : > { %1524 = vmatpush3.msra.mxu1 %v486_v7  ;;  %1512 = vmatprep.subr.mxu0 %v1625_v2  ;;  %v648_v26 = vld [vmem:[%s1876_s8] sm:$0xff] }
  0x14   : > { %1526 = vmatmul.mubr.msk.f32.vlgmr.msra.gmra.mxu1 %vm412_vm0, %v400_v8  ;;  %1513 = vmatpush3.msra.mxu0 %v401_v9 }
  0x15   : > { %1514 = vmatprep.mubr.msk.f32.mxu0 %vm1626_vm1, %v1625_v2  ;;  %1528 = vmatprep.subr.mxu1 %v1625_v2 }
  0x16   : > { %1515 = vmatmul.mubr.msk.f32.vlgmr.msra.gmra.mxu0 %vm412_vm0, %v1749_v10  ;;  %1530 = vmatprep.mubr.msk.f32.mxu1 %vm1626_vm1, %v1625_v2 }
  0x17   : > { %1538 = vmatprep.subr.mxu0 %v1625_v2  ;;  %1540 = vmatprep.mubr.msk.f32.mxu0 %vm1626_vm1, %v1625_v2 }
  0xd4   : > { %v566_v12 = vpop.f32.mrf.mxu1 }
  0xd5   : > { %v1768_v14 = vadd.f32 %v1452_v11, %v566_v12 }
  0xd6   : > { %v482_v15 = vpop.f32.mrf.mxu0  ;;  %v1527_v16 = vpop.f32.mrf.mxu1 }
  0xd7   : > { %v483_v17 = vadd.f32 %v1450_v13, %v482_v15  ;;  %908 = vrot.lane.b32.xlu1 %v1768_v14, %s1627_s28  ;;  %739 = vrot.lane.b32.xlu0 %v1768_v14, %s1628_s29 }
  0xd8   : > { %1529 = vmatpush3.xpose.msk.msra.mxu1 %vm570_vm2, %v1768_v14  ;;  %v1516_v18 = vpop.f32.mrf.mxu0 }
  0xd9   : > { %1533 = vmatprep.subr.mxu1 %v1625_v2 }
  0xdb   : > { %1531 = vmatmul.mubr.msk.f32.vlgmr.msra.gmra.mxu1 %vm570_vm2, %v483_v17  ;;  %906 = vrot.lane.b32.xlu1 %v483_v17, %s1627_s28  ;;  %s398_s28 = scalar_lea.vmem %s1879_s11, %s1727_s12 }
  0xdc   : > { %737 = vrot.lane.b32.xlu0 %v483_v17, %s1628_s29  ;;  %1535 = vmatprep.mubr.msk.f32.mxu1 %vm1626_vm1, %v1625_v2 }
  0xdf   : > { %1075 = vrot.lane.b32.xlu1 %v483_v17, %s1629_s30 }
  0xe0   : > { %1077 = vrot.lane.b32.xlu0 %v1768_v14, %s1629_s30 }
 0x149   : > { %v740_v19 = vpop.permute.xlu0 %739  ;;  %v909_v20 = vpop.permute.xlu1 %908 }
 0x14a   : > { %1539 = vmatpush3.xpose.msk.msra.mxu0 %vm570_vm2, %v740_v19 }
 0x14b   : > { %1548 = vmatprep.subr.mxu0 %v1625_v2 }
 0x14d   : > { %v907_v22 = vpop.permute.xlu1 %906 }
 0x14e   : > { %v738_v21 = vpop.permute.xlu0 %737 }
 0x14f   : > { %1541 = vmatmul.mubr.msk.f32.vlgmr.msra.gmra.mxu0 %vm570_vm2, %v738_v21 }
 0x150   : > { %1549 = vmatpush3.xpose.msk.msra.mxu0 %vm570_vm2, %v909_v20  ;;  %1550 = vmatprep.mubr.msk.f32.mxu0 %vm1626_vm1, %v1625_v2 }
 0x151   : > { %1558 = vmatprep.subr.mxu0 %v1625_v2  ;;  %v1076_v24 = vpop.permute.xlu1 %1075 }
 0x152   : > { %v1078_v23 = vpop.permute.xlu0 %1077 }
 0x153   : > { %1551 = vmatmul.mubr.msk.f32.vlgmr.msra.gmra.mxu0 %vm570_vm2, %v907_v22 }
 0x154   : > { %1559 = vmatpush3.xpose.msk.msra.mxu0 %vm570_vm2, %v1078_v23  ;;  %1560 = vmatprep.mubr.msk.f32.mxu0 %vm1626_vm1, %v1625_v2 }
 0x155   : > { %1568 = vmatprep.subr.mxu0 %v1625_v2 }
 0x157   : > { %1561 = vmatmul.mubr.msk.f32.vlgmr.msra.gmra.mxu0 %vm570_vm2, %v1076_v24 }
 0x158   : > { %1576 = vmatprep.mubr.msk.f32.mxu0 %vm1626_vm1, %v1625_v2 }
 0x19b   : > { %v643_v25 = vpop.f32.mrf.mxu1 }
 0x19c   : > { %v647_v27 = vmul.f32 0.35355338, %v643_v25  ;;  %v1264_v25 = vld [vmem:[%s1874_s6 + $0x18] sm:$0xff] }
 0x19d   : > { %v1532_v28 = vpop.f32.mrf.mxu1  ;;  %1569 = vmatpush3.msra.mxu0 %v1264_v25 }
 0x19e   : > { %v649_v29 = vadd.f32 %v648_v26, %v647_v27  ;;  %1570 = vmatprep.subr.mxu0 %v1625_v2  ;;  %v1263_v26 = vld [vmem:[%s1874_s6 + $0x10] sm:$0xff]  ;;  %v1262_v27 = vld [vmem:[%s1874_s6 + $0x8] sm:$0xff]  ;;  %v1261_v28 = vld [vmem:[%s1874_s6] sm:$0xff] }
 0x19f   : > { %1571 = vmatpush3.msra.mxu0 %v1263_v26 }
 0x1a0   : > { %v650_v30 = vsel %vm570_vm2, %v649_v29, -inf  ;;  %1572 = vmatprep.subr.mxu0 %v1625_v2 }
 0x1a1   : > { %651 = vmax.xlane.f32.xlu0 %v650_v30  ;;  %1573 = vmatpush3.msra.mxu0 %v1262_v27 }
 0x1a2   : > { %1574 = vmatprep.subr.mxu0 %v1625_v2 }
 0x1a3   : > { %1575 = vmatpush3.msra.mxu0 %v1261_v28 }
 0x20f   : > { %v811_v31 = vpop.f32.mrf.mxu0 }
 0x210   : > { %v815_v33 = vmul.f32 0.35355338, %v811_v31 }
 0x211   : > { %v1542_v34 = vpop.f32.mrf.mxu0 }
 0x212   : > { %v818_v35 = vadd.f32 %v1459_v32, %v815_v33 }
 0x213   : > { %v980_v36 = vpop.f32.mrf.mxu0 }
 0x214   : > { %v984_v38 = vmul.f32 0.35355338, %v980_v36  ;;  %v819_v39 = vsel %vm570_vm2, %v818_v35, -inf }
 0x215   : > { %820 = vmax.xlane.f32.xlu1 %v819_v39  ;;  %v1552_v40 = vpop.f32.mrf.mxu0 }
 0x216   : > { %v987_v41 = vadd.f32 %v1463_v37, %v984_v38  ;;  %v1469_v40 = vld [vmem:[%s1875_s7] ss:$0 sm:$0xff] }
 0x217   : > { %v1149_v42 = vpop.f32.mrf.mxu0 }
 0x218   : > { %v1153_v44 = vmul.f32 0.35355338, %v1149_v42  ;;  %v988_v45 = vsel %vm570_vm2, %v987_v41, -inf }
 0x219   : > { %989 = vmax.xlane.f32.xlu0 %v988_v45  ;;  %v1562_v46 = vpop.f32.mrf.mxu0 }
 0x21a   : > { %v1156_v47 = vadd.f32 %v1467_v43, %v1153_v44 }
 0x21c   : > { %v1157_v48 = vsel %vm570_vm2, %v1156_v47, -inf }
 0x21d   : > { %1158 = vmax.xlane.f32.xlu0 %v1157_v48 }
 0x226   : > { %661 = vrot.lane.b32.xlu1 %v1768_v14, %s1630_s22 }
 0x22a   : > { %v652_v49 = vpop.xlane.xlu0 %651 }
 0x22b   : > { %v653_v50 = vsub.f32 %v649_v29, %v652_v49 }
 0x22d   : > { %v654_v51 = vmul.f32 1.442695, %v653_v50 }
 0x22f   : > { %1599 = vpow2.f32 %v654_v51 }
 0x23c   : > { %v1600_v52 = vpop.eup %1599 }
 0x23d   : > { %v656_v53 = vsel %vm570_vm2, %v1600_v52, 0.0 }
 0x24a   : > { %657 = vadd.xlane.f32.xlu1 %v656_v53 }
 0x29e   : > { %v821_v54 = vpop.xlane.xlu1 %820 }
 0x29f   : > { %v822_v55 = vsub.f32 %v818_v35, %v821_v54 }
 0x2a1   : > { %v823_v56 = vmul.f32 1.442695, %v822_v55 }
 0x2a2   : > { %v662_v57 = vpop.permute.xlu1 %661  ;;  %v990_v58 = vpop.xlane.xlu0 %989 }
 0x2a3   : > { %1601 = vpow2.f32 %v823_v56  ;;  %v991_v59 = vsub.f32 %v987_v41, %v990_v58  ;;  %1534 = vmatpush3.msra.mxu1 %v662_v57  ;;  %v1472_v56 = vld [vmem:[%s1878_s10] ss:$0 sm:$0xff] }
 0x2a4   : > { %1543 = vmatprep.subr.mxu1 %v1625_v2 }
 0x2a5   : > { %v992_v60 = vmul.f32 1.442695, %v991_v59 }
 0x2a6   : > { %v1159_v61 = vpop.xlane.xlu0 %1158 }
 0x2a7   : > { %1603 = vpow2.f32 %v992_v60  ;;  %v1160_v62 = vsub.f32 %v1156_v47, %v1159_v61 }
 0x2a9   : > { %v1161_v63 = vmul.f32 1.442695, %v1160_v62 }
 0x2ab   : > { %1605 = vpow2.f32 %v1161_v63 }
 0x2b0   : > { %v1602_v0 = vpop.eup %1601 }
 0x2b1   : > { %v825_v1 = vsel %vm570_vm2, %v1602_v0, 0.0 }
 0x2b2   : > { %826 = vadd.xlane.f32.xlu0 %v825_v1 }
 0x2b4   : > { %v1604_v3 = vpop.eup %1603 }
 0x2b5   : > { %v994_v4 = vsel %vm570_vm2, %v1604_v3, 0.0 }
 0x2b6   : > { %995 = vadd.xlane.f32.xlu1 %v994_v4 }
 0x2b8   : > { %v1606_v5 = vpop.eup %1605 }
 0x2b9   : > { %v1163_v6 = vsel %vm570_vm2, %v1606_v5, 0.0 }
 0x2ba   : > { %1164 = vadd.xlane.f32.xlu0 %v1163_v6 }
 0x2c7   : > { %999 = vrot.lane.b32.xlu1 %v1768_v14, %s1631_s23 }
 0x2cb   : > { %1168 = vrot.lane.b32.xlu1 %v1768_v14, %s1632_s24 }
 0x2d0   : > { %830 = vrot.lane.b32.xlu0 %v1768_v14, %s1633_s25 }
 0x2d3   : > { %v658_v7 = vpop.xlane.xlu1 %657 }
 0x2d4   : > { %1607 = vrcp.f32 %v658_v7 }
 0x2e1   : > { %v1608_v8 = vpop.eup %1607 }
 0x2e2   : > { %v660_v9 = vmul.f32 %v1608_v8, %v1600_v52 }
 0x2e4   : > { %1536 = vmatmul.mubr.msk.f32.vlgmr.msra.gmra.mxu1 %vm570_vm2, %v660_v9 }
 0x2e5   : > { %1545 = vmatprep.mubr.msk.f32.mxu1 %vm1626_vm1, %v1625_v2 }
 0x33b   : > { %v827_v11 = vpop.xlane.xlu0 %826 }
 0x33c   : > { %1609 = vrcp.f32 %v827_v11 }
 0x33f   : > { %v996_v12 = vpop.xlane.xlu1 %995 }
 0x340   : > { %1611 = vrcp.f32 %v996_v12 }
 0x343   : > { %v1165_v13 = vpop.xlane.xlu0 %1164  ;;  %v1000_v14 = vpop.permute.xlu1 %999 }
 0x344   : > { %1613 = vrcp.f32 %v1165_v13 }
 0x347   : > { %v831_v15 = vpop.permute.xlu0 %830  ;;  %v1169_v20 = vpop.permute.xlu1 %1168 }
 0x348   : > { %1544 = vmatpush3.msra.mxu1 %v831_v15 }
 0x349   : > { %v1610_v16 = vpop.eup %1609  ;;  %1553 = vmatprep.subr.mxu1 %v1625_v2 }
 0x34a   : > { %v829_v17 = vmul.f32 %v1610_v16, %v1602_v0 }
 0x34c   : > { %1546 = vmatmul.mubr.msk.f32.vlgmr.msra.gmra.mxu1 %vm570_vm2, %v829_v17 }
 0x34d   : > { %v1612_v18 = vpop.eup %1611  ;;  %1554 = vmatpush3.msra.mxu1 %v1000_v14  ;;  %1555 = vmatprep.mubr.msk.f32.mxu1 %vm1626_vm1, %v1625_v2 }
 0x34e   : > { %1563 = vmatprep.subr.mxu1 %v1625_v2  ;;  %v998_v19 = vmul.f32 %v1612_v18, %v1604_v3 }
 0x350   : > { %1556 = vmatmul.mubr.msk.f32.vlgmr.msra.gmra.mxu1 %vm570_vm2, %v998_v19 }
 0x351   : > { %v1614_v21 = vpop.eup %1613  ;;  %1564 = vmatpush3.msra.mxu1 %v1169_v20  ;;  %1565 = vmatprep.mubr.msk.f32.mxu1 %vm1626_vm1, %v1625_v2 }
 0x352   : > { %v1167_v22 = vmul.f32 %v1614_v21, %v1606_v5 }
 0x354   : > { %1566 = vmatmul.mubr.msk.f32.vlgmr.msra.gmra.mxu1 %vm570_vm2, %v1167_v22 }
 0x3a4   : > { %v733_v23 = vpop.f32.mrf.mxu1 }
 0x3a6   : > { %v1537_v24 = vpop.f32.mrf.mxu1 }
 0x40c   : > { %v902_v29 = vpop.f32.mrf.mxu1 }
 0x40d   : > { %1245 = vrot.lane.b32.xlu0 %v902_v29, %s1634_s16 }
 0x40e   : > { %v1547_v30 = vpop.f32.mrf.mxu1 }
 0x410   : > { %v1071_v31 = vpop.f32.mrf.mxu1 }
 0x411   : > { %1249 = vrot.lane.b32.xlu1 %v1071_v31, %s1635_s19 }
 0x412   : > { %v1557_v32 = vpop.f32.mrf.mxu1 }
 0x414   : > { %v1240_v33 = vpop.f32.mrf.mxu1 }
 0x415   : > { %1253 = vrot.lane.b32.xlu0 %v1240_v33, %s1636_s18 }
 0x416   : > { %v1567_v34 = vpop.f32.mrf.mxu1 }
 0x47f   : > { %v1246_v35 = vpop.permute.xlu0 %1245 }
 0x480   : > { %v1256_v36 = vsel %vm570_vm2, %v733_v23, %v1246_v35 }
 0x483   : > { %v1250_v2 = vpop.permute.xlu1 %1249 }
 0x484   : > { %v1258_v37 = vsel %vm1257_vm3, %v1256_v36, %v1250_v2 }
 0x487   : > { %v1254_v38 = vpop.permute.xlu0 %1253 }
 0x488   : > { %v1260_v39 = vsel %vm1259_vm4, %v1258_v37, %v1254_v38 }
 0x489   : > { %1577 = vmatmul.mubr.msk.f32.vlgmr.msra.gmra.mxu0 %vm412_vm0, %v1260_v39 }
 0x549   : > { %v1341_v41 = vpop.f32.mrf.mxu0 }
 0x54a   : > { %v1342_v42 = vadd.f32 %v1469_v40, %v1341_v41 }
 0x54b   : > { %v1578_v43 = vpop.f32.mrf.mxu0 }
 0x54c   : > { %v1345_v44 = vadd.f32 %v1342_v42, %v1749_v10  ;;  %v1471_v10 = vld [vmem:[%s1877_s9] ss:$0 sm:$0xff] }
 0x54e   : > { %v1346_v45 = vsel %vm412_vm0, %v1345_v44, 0.0 }
 0x54f   : > { %1347 = vadd.xlane.f32.xlu1 %v1346_v45 }
 0x5d8   : > { %v1348_v46 = vpop.xlane.xlu1 %1347 }
 0x5d9   : > { %v1350_v47 = vmul.f32 0.03125, %v1348_v46 }
 0x5db   : > { %v1351_v48 = vsub.f32 %v1345_v44, %v1350_v47 }
 0x5dd   : > { %v1352_v49 = vmul.f32 %v1351_v48, %v1351_v48 }
 0x5df   : > { %v1353_v50 = vsel %vm412_vm0, %v1352_v49, 0.0 }
 0x5e0   : > { %1354 = vadd.xlane.f32.xlu0 %v1353_v50 }
 0x669   : > { %v1355_v51 = vpop.xlane.xlu0 %1354 }
 0x66a   : > { %v1356_v52 = vmul.f32 0.03125, %v1355_v51 }
 0x66c   : > { %v1357_v53 = vadd.f32 1e-05, %v1356_v52 }
 0x66e   : > { %1615 = vrsqrt.f32 %v1357_v53 }
 0x67b   : > { %v1616_v54 = vpop.eup %1615 }
 0x67c   : > { %v1359_v55 = vmul.f32 %v1616_v54, %v1351_v48 }
 0x67e   : > { %v1367_v57 = vmul.f32 %v1471_v10, %v1359_v55 }
 0x680   : > { %v1375_v58 = vadd.f32 %v1472_v56, %v1367_v57 }
 0x682   : > { %1376 = vst.msk [vmem:[%s398_s28] sm:$0xff] %vm412_vm0, %v1375_v58 }
 0x683 PF: > { %s21_s17 = sadd.s32 1, %s1623_s17  }
 0x684   : > { %p18_p4 = scmp.ge.s32.totalorder %s21_s17, 4  }
 0x686   :  { %20 = sbr.rel (!%p18_p4) target bundleno = 1 (0x1), region = 100 }

</bundles_post_ra>
